<compile_context>
chip_gen: v6e
topology: v6e:2x2x1
jax: 0.10.0
libtpu: 0.0.40
codegen_flags: <defaults>
</compile_context>

<pallas_src>
import math
import numpy as np
import jax
import jax.numpy as jnp
from jax import lax
from jax.experimental import pallas as pl
from jax.experimental.pallas import tpu as pltpu


# Static capability check (review: no bare try/except fallback around Buffered).
_HAS_BUFFERED = hasattr(pl, "Buffered")


# ----------------------------------------------------------------------------
# Pallas kernel: one (Tt, Bt, C) tile of the RWKV_TimeMix forward.
# ----------------------------------------------------------------------------
def _rwkv_timemix_kernel(x_ref, w_cur_ref, w_prev_ref, w_out_ref, decay_ref,
                         first_ref, o_ref,
                         kvr_scr, num_scr, den_scr,
                         aa_scr, bb_scr, pp_scr, pprev_scr):
    # x_ref block: (1, Tt, Bt, C) bf16 — time-major inside the tile.
    _, Tt, Bt, C = x_ref.shape
    A = decay_ref.shape[-1]
    M = Tt * Bt
    j = pl.program_id(1)                       # T-tile index (serial axis)

    # ---- reset carried state at the first T tile of each batch tile --------
    @pl.when(j == 0)
    def _():
        aa_scr[...] = jnp.zeros(aa_scr.shape, jnp.float32)
        bb_scr[...] = jnp.zeros(bb_scr.shape, jnp.float32)
        pp_scr[...] = jnp.full(pp_scr.shape, -1e38, jnp.float32)
        pprev_scr[...] = jnp.zeros(pprev_scr.shape, jnp.float32)

    # ---- fused projection: two bf16 MXU matmuls, no concats ----------------
    # [k|v|r](t) = x(t) @ W_cur + x(t-1) @ W_prev   (time-mix folded into W).
    xf = x_ref[...].reshape(M, C).astype(jnp.bfloat16)
    p_cur = jnp.dot(xf, w_cur_ref[...], preferred_element_type=jnp.float32)
    p_prev = jnp.dot(xf, w_prev_ref[...], preferred_element_type=jnp.float32)

    # Time shift = a Bt-row offset on p_prev; row block 0 uses the carried
    # last-row projection of the previous T tile (zeros at global t == 0).
    kvr_scr[pl.ds(0, Bt), :] = p_cur[:Bt] + pprev_scr[...]
    kvr_scr[pl.ds(Bt, M - Bt), :] = p_cur[Bt:] + p_prev[:M - Bt]
    pprev_scr[...] = p_prev[M - Bt:]

    # Recurrence constants, broadcast once (hoisted out of the serial loop).
    w = jnp.broadcast_to(-jnp.exp(decay_ref[...]), (Bt, A))
    u = jnp.broadcast_to(first_ref[...], (Bt, A))

    # ---- pass 1: serial WKV over Tt steps -----------------------------------
    # Stores the per-step output numerator/denominator (num, den); only
    # (aa, bb, pp) is loop-carried.  The output-half exps are off the carried
    # dependency chain, so under unroll they fill otherwise-idle EUP slots.
    def body(t, carry):
        aa, bb, pp = carry                              # (Bt, A) each, f32
        off = pl.multiple_of(t * Bt, Bt)
        kk = kvr_scr[pl.ds(off, Bt), pl.ds(0, A)]
        vv = kvr_scr[pl.ds(off, Bt), pl.ds(A, A)]
        # output half (uses the pre-update state)
        wo = u + kk
        qo = jnp.maximum(pp, wo)
        e1o = jnp.exp(pp - qo)
        e2o = jnp.exp(wo - qo)
        num_scr[pl.ds(off, Bt), :] = e1o * aa + e2o * vv
        den_scr[pl.ds(off, Bt), :] = e1o * bb + e2o
        # state half
        ws = pp + w
        qs = jnp.maximum(ws, kk)
        e1 = jnp.exp(ws - qs)
        e2 = jnp.exp(kk - qs)
        return (e1 * aa + e2 * vv, e1 * bb + e2, qs)

    init = (aa_scr[...], bb_scr[...], pp_scr[...])
    aa, bb, pp = lax.fori_loop(0, Tt, body, init, unroll=min(8, Tt))
    aa_scr[...] = aa                                    # carry to next T tile
    bb_scr[...] = bb
    pp_scr[...] = pp

    # ---- pass 2: vectorized epilogue over the (M, A) tile -------------------
    # (The T tiling already bounds this working set; no extra chunking needed.)
    sr = jax.nn.sigmoid(kvr_scr[:, pl.ds(2 * A, A)])
    wkv = num_scr[...] * pl.reciprocal(den_scr[...], approx=True)
    rwkv = (sr * wkv).astype(jnp.bfloat16)
    out = jnp.dot(rwkv, w_out_ref[...], preferred_element_type=jnp.float32)
    # TODO(synk): optionally emit a bf16 output to halve the output HBM stream.
    o_ref[...] = out.reshape(1, Tt, Bt, C).astype(o_ref.dtype)


# ----------------------------------------------------------------------------
# Host-side weight fusion (folds time-mix into the projections, split weights).
# ----------------------------------------------------------------------------
def _fuse_weights(params, dtype=jnp.bfloat16):
    tmk, tmv, tmr = params["tmk"][0], params["tmv"][0], params["tmr"][0]  # (C,)
    wk, wv, wr = params["wk"], params["wv"], params["wr"]                  # (C, A)
    w_cur = jnp.concatenate([wk * tmk[:, None], wv * tmv[:, None],
                             wr * tmr[:, None]], axis=1)                   # (C, 3A)
    w_prev = jnp.concatenate([wk * (1.0 - tmk)[:, None],
                              wv * (1.0 - tmv)[:, None],
                              wr * (1.0 - tmr)[:, None]], axis=1)          # (C, 3A)
    # TODO(synk): keep the k columns in fp32 (separate matmul) if the exp() of
    # a bf16 k is not accurate enough (e.g. for training).
    return w_cur.astype(dtype), w_prev.astype(dtype), params["wo"].astype(dtype)


def _pick_batch_tile(B, max_tile=32):
    # Fat batch tiles -> fewer serial WKV iterations, but keep >= 2 parallel
    # grid steps when possible so both v7x TensorCores get work.
    for bt in (32, 16, 8):
        if bt <= max_tile and B % bt == 0 and B // bt >= 2:
            return bt
    for bt in (32, 16, 8):
        if bt <= max_tile and B % bt == 0:
            return bt
    return B


def _pick_time_tile(T, Bt, target_rows=512):
    # Aim for ~target_rows MXU rows per grid step; must divide T.
    tt = max(1, min(T, target_rows // max(Bt, 1)))
    while T % tt:
        tt -= 1
    return tt


def _physical_vmem_bytes():
    # Generation-aware physical VMEM (v5e/v6e: 128 MiB, v7x: 64 MiB per TC).
    # Pure hardware query — a failure here is not a kernel-lowering error, so
    # fall back to the conservative 128 MiB rather than aborting.
    get_info = getattr(pltpu, "get_tpu_info", None)
    if get_info is not None:
        try:
            cap = getattr(get_info(), "vmem_capacity_bytes", None)
            if cap:
                return int(cap)
        except Exception:  # hardware query only (see comment above)
            pass
    return 128 * 1024 * 1024


def _estimate_vmem_bytes(Tt, Bt, C, A, single_buffered_weights):
    f32, bf16 = 4, 2
    rows = Tt * Bt
    scratch = (rows * 3 * A            # kvr
               + 2 * rows * A          # num, den
               + 3 * Bt * A            # aa, bb, pp carries
               + Bt * 3 * A) * f32     # time-shift carry
    io = 2 * rows * C * bf16 + 2 * rows * C * f32      # double-buffered x/out
    wbuf = 1 if single_buffered_weights else 2
    weights = wbuf * ((2 * C * 3 * A + A * C) * bf16 + 2 * A * f32)
    return scratch + io + weights


def _const_spec(shape, single_buffered):
    kwargs = {}
    if single_buffered:
        kwargs["pipeline_mode"] = pl.Buffered(1)       # weights: single buffer
    return pl.BlockSpec(shape, lambda i, j: (0,) * len(shape), **kwargs)


# ----------------------------------------------------------------------------
# Wrapper
# ----------------------------------------------------------------------------
def rwkv_timemix_pallas(x, params, *, batch_tile=None, time_tile=None):
    B, T, C = x.shape
    A = params["wk"].shape[1]
    Bt = _pick_batch_tile(B) if batch_tile is None else batch_tile
    Tt = _pick_time_tile(T, Bt) if time_tile is None else time_tile
    assert B % Bt == 0 and T % Tt == 0
    n_b, n_t = B // Bt, T // Tt

    w_cur, w_prev, w_out = _fuse_weights(params)

    # (B, T, C) -> (B//Bt, T, Bt, C): each (Tt, Bt, C) grid block is one
    # contiguous DMA; x cast to bf16 host-side (matmuls already run in bf16).
    x4 = x.astype(jnp.bfloat16).reshape(n_b, Bt, T, C).transpose(0, 2, 1, 3)

    need = _estimate_vmem_bytes(Tt, Bt, C, A, _HAS_BUFFERED)
    phys = _physical_vmem_bytes()
    vmem_limit = max(32 << 20, min(int(1.5 * need) + (4 << 20), (phys * 3) // 4))

    # TODO(synk): sweep pl.Buffered(2) vs (3) on the x input once a trace shows
    # exposed DMA, and consider pltpu.CORE_PARALLEL on the batch axis on v7x.
    out4 = pl.pallas_call(
        _rwkv_timemix_kernel,
        out_shape=jax.ShapeDtypeStruct((n_b, T, Bt, C), jnp.float32),
        grid=(n_b, n_t),
        in_specs=[
            pl.BlockSpec((1, Tt, Bt, C), lambda i, j: (i, j, 0, 0)),   # x
            _const_spec((C, 3 * A), _HAS_BUFFERED),                    # W_cur
            _const_spec((C, 3 * A), _HAS_BUFFERED),                    # W_prev
            _const_spec((A, C), _HAS_BUFFERED),                        # W_out
            _const_spec((1, A), _HAS_BUFFERED),                        # time_decay
            _const_spec((1, A), _HAS_BUFFERED),                        # time_first
        ],
        out_specs=pl.BlockSpec((1, Tt, Bt, C), lambda i, j: (i, j, 0, 0)),
        scratch_shapes=[
            pltpu.VMEM((Tt * Bt, 3 * A), jnp.float32),   # kvr = [k|v|r]
            pltpu.VMEM((Tt * Bt, A), jnp.float32),       # num
            pltpu.VMEM((Tt * Bt, A), jnp.float32),       # den
            pltpu.VMEM((Bt, A), jnp.float32),            # aa carry
            pltpu.VMEM((Bt, A), jnp.float32),            # bb carry
            pltpu.VMEM((Bt, A), jnp.float32),            # pp carry
            pltpu.VMEM((Bt, 3 * A), jnp.float32),        # time-shift carry
        ],
        compiler_params=pltpu.CompilerParams(
            dimension_semantics=("parallel", "arbitrary"),
            vmem_limit_bytes=int(vmem_limit)),
    )(x4, w_cur, w_prev, w_out, params["decay"], params["first"])

    return out4.transpose(0, 2, 1, 3).reshape(B, T, C)


# ----------------------------------------------------------------------------
# Deterministic parameter construction (mirrors the torch __init__ math)
# ----------------------------------------------------------------------------
def make_params(n_embd, dim_att, n_layer, layer_id, key):
    ratio_0_to_1 = layer_id / (n_layer - 1)
    ratio_1_to_almost0 = 1.0 - layer_id / n_layer

    ddd = np.arange(n_embd, dtype=np.float64) / n_embd
    h = np.arange(dim_att, dtype=np.float64)
    decay_speed = -5.0 + 8.0 * (h / (dim_att - 1)) ** (0.7 + 1.3 * ratio_0_to_1)
    zigzag = (np.array([(i + 1) % 3 - 1 for i in range(dim_att)],
                       dtype=np.float64)) * 0.5
    time_first = np.ones(dim_att) * math.log(0.3) + zigzag

    tmk = ddd ** ratio_1_to_almost0
    tmv = ddd ** ratio_1_to_almost0 + 0.3 * ratio_0_to_1
    tmr = ddd ** (0.5 * ratio_1_to_almost0)

    k1, k2, k3, k4 = jax.random.split(key, 4)
    scale_in = 1.0 / math.sqrt(n_embd)
    scale_att = 1.0 / math.sqrt(dim_att)
    # nn.Linear stores weight (out, in); we pre-transpose to (in, out).
    wk = jax.random.normal(k1, (n_embd, dim_att), jnp.float32) * scale_in
    wv = jax.random.normal(k2, (n_embd, dim_att), jnp.float32) * scale_in
    wr = jax.random.normal(k3, (n_embd, dim_att), jnp.float32) * scale_in
    wo = jax.random.normal(k4, (dim_att, n_embd), jnp.float32) * scale_att

    return {
        "tmk": jnp.asarray(tmk, jnp.float32).reshape(1, n_embd),
        "tmv": jnp.asarray(tmv, jnp.float32).reshape(1, n_embd),
        "tmr": jnp.asarray(tmr, jnp.float32).reshape(1, n_embd),
        "decay": jnp.asarray(decay_speed, jnp.float32).reshape(1, dim_att),
        "first": jnp.asarray(time_first, jnp.float32).reshape(1, dim_att),
        "wk": wk, "wv": wv, "wr": wr, "wo": wo,
    }


# ----------------------------------------------------------------------------
# Pure-JAX fp32 reference (for correctness check)
# ----------------------------------------------------------------------------
def rwkv_timemix_ref(x, p):
    xx = jnp.concatenate([jnp.zeros_like(x[:, :1]), x[:, :-1]], axis=1)
    xk = x * p["tmk"] + xx * (1 - p["tmk"])
    xv = x * p["tmv"] + xx * (1 - p["tmv"])
    xr = x * p["tmr"] + xx * (1 - p["tmr"])
    k = xk @ p["wk"]
    v = xv @ p["wv"]
    sr = jax.nn.sigmoid(xr @ p["wr"])
    w = -jnp.exp(p["decay"][0])
    u = p["first"][0]

    def scan_fn(carry, kv):
        aa, bb, pp = carry
        kk, vv = kv
        ww = u + kk
        qq = jnp.maximum(pp, ww)
        e1, e2 = jnp.exp(pp - qq), jnp.exp(ww - qq)
        y = (e1 * aa + e2 * vv) / (e1 * bb + e2)
        ww2 = pp + w
        qq2 = jnp.maximum(ww2, kk)
        e1, e2 = jnp.exp(ww2 - qq2), jnp.exp(kk - qq2)
        return (e1 * aa + e2 * vv, e1 * bb + e2, qq2), y

    def per_batch(kb, vb):
        A = kb.shape[-1]
        init = (jnp.zeros(A), jnp.zeros(A), jnp.full((A,), -1e38))
        _, y = lax.scan(scan_fn, init, (kb, vb))
        return y

    wkv = jax.vmap(per_batch)(k, v)
    return (sr * wkv) @ p["wo"]


if __name__ == "__main__":
    # Small but lane-dense demo shapes: A = C = 128 keeps every column slice on
    # whole 128-lane groups and the output stores unmasked; B=32 -> Bt=16 gives
    # 2 parallel batch tiles (megacore), and time_tile=8 -> 2 T tiles per batch
    # tile so the carried (aa, bb, pp) state and the time-shift boundary across
    # T tiles are exercised.
    B, T, C, A = 32, 16, 128, 128
    n_layer, layer_id = 4, 1

    key = jax.random.PRNGKey(0)
    kx, kp = jax.random.split(key)
    x = jax.random.normal(kx, (B, T, C), jnp.float32)
    params = make_params(C, A, n_layer, layer_id, kp)

    out = jax.block_until_ready(rwkv_timemix_pallas(x, params, time_tile=8))
    ref = jax.block_until_ready(rwkv_timemix_ref(x, params))

    # Tolerance reflects bf16 x/weights feeding exp() in the recurrence and the
    # approximate reciprocal; the recurrence itself runs in fp32.
    np.testing.assert_allclose(np.asarray(out), np.asarray(ref),
                               rtol=4e-2, atol=4e-2)
    print("KERNEL_OK")
</pallas_src>

<mosaic_0001>
module attributes {stable_mosaic.version = 11 : i64} {
  func.func @_rwkv_timemix_kernel(%arg0: i32, %arg1: i32, %arg2: memref<1x8x16x128xbf16, #tpu.memory_space<vmem>>, %arg3: memref<128x384xbf16, #tpu.memory_space<vmem>>, %arg4: memref<128x384xbf16, #tpu.memory_space<vmem>>, %arg5: memref<128x128xbf16, #tpu.memory_space<vmem>>, %arg6: memref<1x128xf32, #tpu.memory_space<vmem>>, %arg7: memref<1x128xf32, #tpu.memory_space<vmem>>, %arg8: memref<1x8x16x128xf32, #tpu.memory_space<vmem>>, %arg9: memref<128x384xf32, #tpu.memory_space<vmem>>, %arg10: memref<128x128xf32, #tpu.memory_space<vmem>>, %arg11: memref<128x128xf32, #tpu.memory_space<vmem>>, %arg12: memref<16x128xf32, #tpu.memory_space<vmem>>, %arg13: memref<16x128xf32, #tpu.memory_space<vmem>>, %arg14: memref<16x128xf32, #tpu.memory_space<vmem>>, %arg15: memref<16x384xf32, #tpu.memory_space<vmem>>) attributes {dimension_semantics = [#tpu.dimension_semantics<parallel>, #tpu.dimension_semantics<arbitrary>], iteration_bounds = array<i64: 2, 2>, scalar_prefetch = 0 : i64, scratch_operands = 7 : i64, tpu.core_type = #tpu.core_type<tc>, window_params = [{transform_indices = @transform_0, window_bounds = array<i64: 1, 8, 16, 128>}, {pipeline_mode = #tpu.pipeline_mode<synchronous>, transform_indices = @transform_1, window_bounds = array<i64: 128, 384>}, {pipeline_mode = #tpu.pipeline_mode<synchronous>, transform_indices = @transform_2, window_bounds = array<i64: 128, 384>}, {pipeline_mode = #tpu.pipeline_mode<synchronous>, transform_indices = @transform_3, window_bounds = array<i64: 128, 128>}, {pipeline_mode = #tpu.pipeline_mode<synchronous>, transform_indices = @transform_4, window_bounds = array<i64: 1, 128>}, {pipeline_mode = #tpu.pipeline_mode<synchronous>, transform_indices = @transform_5, window_bounds = array<i64: 1, 128>}, {transform_indices = @transform_6, window_bounds = array<i64: 1, 8, 16, 128>}]} {
    %c0_i32 = arith.constant 0 : i32
    %0 = arith.cmpi eq, %arg1, %c0_i32 : i32
    %1 = arith.extui %0 : i1 to i32
    %c0_i32_0 = arith.constant 0 : i32
    %2 = arith.cmpi ne, %1, %c0_i32_0 : i32
    scf.if %2 {
      %cst_85 = arith.constant 0.000000e+00 : f32
      %306 = vector.broadcast %cst_85 : f32 to vector<16x128xf32>
      %c0_86 = arith.constant 0 : index
      %c0_87 = arith.constant 0 : index
      %307 = vector.load %arg12[%c0_86, %c0_87] : memref<16x128xf32, #tpu.memory_space<vmem>>, vector<16x128xf32>
      tpu.vector_store %arg12[%c0_86, %c0_87], %306 {strides = array<i32>} : memref<16x128xf32, #tpu.memory_space<vmem>>, vector<16x128xf32>,
      %cst_88 = arith.constant 0.000000e+00 : f32
      %308 = vector.broadcast %cst_88 : f32 to vector<16x128xf32>
      %c0_89 = arith.constant 0 : index
      %c0_90 = arith.constant 0 : index
      %309 = vector.load %arg13[%c0_89, %c0_90] : memref<16x128xf32, #tpu.memory_space<vmem>>, vector<16x128xf32>
      tpu.vector_store %arg13[%c0_89, %c0_90], %308 {strides = array<i32>} : memref<16x128xf32, #tpu.memory_space<vmem>>, vector<16x128xf32>,
      %cst_91 = arith.constant -9.99999968E+37 : f32
      %310 = vector.broadcast %cst_91 : f32 to vector<16x128xf32>
      %c0_92 = arith.constant 0 : index
      %c0_93 = arith.constant 0 : index
      %311 = vector.load %arg14[%c0_92, %c0_93] : memref<16x128xf32, #tpu.memory_space<vmem>>, vector<16x128xf32>
      tpu.vector_store %arg14[%c0_92, %c0_93], %310 {strides = array<i32>} : memref<16x128xf32, #tpu.memory_space<vmem>>, vector<16x128xf32>,
      %cst_94 = arith.constant 0.000000e+00 : f32
      %312 = vector.broadcast %cst_94 : f32 to vector<16x384xf32>
      %c0_95 = arith.constant 0 : index
      %c0_96 = arith.constant 0 : index
      %313 = vector.load %arg15[%c0_95, %c0_96] : memref<16x384xf32, #tpu.memory_space<vmem>>, vector<16x384xf32>
      tpu.vector_store %arg15[%c0_95, %c0_96], %312 {strides = array<i32>} : memref<16x384xf32, #tpu.memory_space<vmem>>, vector<16x384xf32>,
    } else {
    }
    %c0 = arith.constant 0 : index
    %c0_1 = arith.constant 0 : index
    %c0_2 = arith.constant 0 : index
    %c0_3 = arith.constant 0 : index
    %3 = vector.load %arg2[%c0, %c0_1, %c0_2, %c0_3] : memref<1x8x16x128xbf16, #tpu.memory_space<vmem>>, vector<1x8x16x128xbf16>
    %4 = vector.shape_cast %3 : vector<1x8x16x128xbf16> to vector<128x128xbf16>
    %c0_4 = arith.constant 0 : index
    %c0_5 = arith.constant 0 : index
    %5 = vector.load %arg3[%c0_4, %c0_5] : memref<128x384xbf16, #tpu.memory_space<vmem>>, vector<128x384xbf16>
    %cst = arith.constant dense<0.000000e+00> : vector<128x384xf32>
    %6 = tpu.matmul %4, %5, %cst {dimension_numbers = #tpu.dot_dimension_numbers<[1], [0], [0], [1], [0, 0, 1, 1], [], []>} : vector<128x128xbf16>, vector<128x384xbf16>, vector<128x384xf32> -> vector<128x384xf32>
    %c0_6 = arith.constant 0 : index
    %c0_7 = arith.constant 0 : index
    %7 = vector.load %arg4[%c0_6, %c0_7] : memref<128x384xbf16, #tpu.memory_space<vmem>>, vector<128x384xbf16>
    %cst_8 = arith.constant dense<0.000000e+00> : vector<128x384xf32>
    %8 = tpu.matmul %4, %7, %cst_8 {dimension_numbers = #tpu.dot_dimension_numbers<[1], [0], [0], [1], [0, 0, 1, 1], [], []>} : vector<128x128xbf16>, vector<128x384xbf16>, vector<128x384xf32> -> vector<128x384xf32>
    %9 = vector.extract_strided_slice %6 {offsets = [0, 0], sizes = [16, 384], strides = [1, 1]} : vector<128x384xf32> to vector<16x384xf32>
    %c0_9 = arith.constant 0 : index
    %c0_10 = arith.constant 0 : index
    %10 = vector.load %arg15[%c0_9, %c0_10] : memref<16x384xf32, #tpu.memory_space<vmem>>, vector<16x384xf32>
    %11 = arith.addf %9, %10 : vector<16x384xf32>
    %c0_11 = arith.constant 0 : index
    %c0_12 = arith.constant 0 : index
    %12 = vector.load %arg9[%c0_11, %c0_12] : memref<128x384xf32, #tpu.memory_space<vmem>>, vector<16x384xf32>
    tpu.vector_store %arg9[%c0_11, %c0_12], %11 {strides = array<i32>} : memref<128x384xf32, #tpu.memory_space<vmem>>, vector<16x384xf32>,
    %13 = vector.extract_strided_slice %6 {offsets = [16, 0], sizes = [112, 384], strides = [1, 1]} : vector<128x384xf32> to vector<112x384xf32>
    %14 = vector.extract_strided_slice %8 {offsets = [0, 0], sizes = [112, 384], strides = [1, 1]} : vector<128x384xf32> to vector<112x384xf32>
    %15 = arith.addf %13, %14 : vector<112x384xf32>
    %c16 = arith.constant 16 : index
    %c0_13 = arith.constant 0 : index
    %16 = vector.load %arg9[%c16, %c0_13] : memref<128x384xf32, #tpu.memory_space<vmem>>, vector<112x384xf32>
    tpu.vector_store %arg9[%c16, %c0_13], %15 {strides = array<i32>} : memref<128x384xf32, #tpu.memory_space<vmem>>, vector<112x384xf32>,
    %17 = vector.extract_strided_slice %8 {offsets = [112, 0], sizes = [16, 384], strides = [1, 1]} : vector<128x384xf32> to vector<16x384xf32>
    %c0_14 = arith.constant 0 : index
    %c0_15 = arith.constant 0 : index
    %18 = vector.load %arg15[%c0_14, %c0_15] : memref<16x384xf32, #tpu.memory_space<vmem>>, vector<16x384xf32>
    tpu.vector_store %arg15[%c0_14, %c0_15], %17 {strides = array<i32>} : memref<16x384xf32, #tpu.memory_space<vmem>>, vector<16x384xf32>,
    %c0_16 = arith.constant 0 : index
    %c0_17 = arith.constant 0 : index
    %19 = vector.load %arg6[%c0_16, %c0_17] : memref<1x128xf32, #tpu.memory_space<vmem>>, vector<1x128xf32>
    %20 = math.exp %19 : vector<1x128xf32>
    %cst_18 = arith.constant 0.000000e+00 : f32
    %21 = vector.broadcast %cst_18 : f32 to vector<1x128xf32>
    %22 = arith.subf %21, %20 : vector<1x128xf32>
    %23 = vector.shape_cast %22 : vector<1x128xf32> to vector<1x128xf32>
    %24 = vector.broadcast %23 : vector<1x128xf32> to vector<16x128xf32>
    %c0_19 = arith.constant 0 : index
    %c0_20 = arith.constant 0 : index
    %25 = vector.load %arg7[%c0_19, %c0_20] : memref<1x128xf32, #tpu.memory_space<vmem>>, vector<1x128xf32>
    %26 = vector.shape_cast %25 : vector<1x128xf32> to vector<1x128xf32>
    %27 = vector.broadcast %26 : vector<1x128xf32> to vector<16x128xf32>
    %c0_21 = arith.constant 0 : index
    %c0_22 = arith.constant 0 : index
    %28 = vector.load %arg12[%c0_21, %c0_22] : memref<16x128xf32, #tpu.memory_space<vmem>>, vector<16x128xf32>
    %c0_23 = arith.constant 0 : index
    %c0_24 = arith.constant 0 : index
    %29 = vector.load %arg13[%c0_23, %c0_24] : memref<16x128xf32, #tpu.memory_space<vmem>>, vector<16x128xf32>
    %c0_25 = arith.constant 0 : index
    %c0_26 = arith.constant 0 : index
    %30 = vector.load %arg14[%c0_25, %c0_26] : memref<16x128xf32, #tpu.memory_space<vmem>>, vector<16x128xf32>
    %c0_i32_27 = arith.constant 0 : i32
    %c16_i32 = arith.constant 16 : i32
    %31 = arith.muli %c0_i32_27, %c16_i32 : i32
    %32 = tpu.assume_multiple %31, 16 : i32
    %33 = arith.index_cast %32 : i32 to index
    %c0_28 = arith.constant 0 : index
    %34 = vector.load %arg9[%33, %c0_28] : memref<128x384xf32, #tpu.memory_space<vmem>>, vector<16x128xf32>
    %35 = arith.index_cast %32 : i32 to index
    %c128 = arith.constant 128 : index
    %36 = vector.load %arg9[%35, %c128] : memref<128x384xf32, #tpu.memory_space<vmem>>, vector<16x128xf32>
    %37 = arith.addf %27, %34 : vector<16x128xf32>
    %38 = arith.maximumf %30, %37 : vector<16x128xf32>
    %39 = arith.subf %30, %38 : vector<16x128xf32>
    %40 = math.exp %39 : vector<16x128xf32>
    %41 = arith.subf %37, %38 : vector<16x128xf32>
    %42 = math.exp %41 : vector<16x128xf32>
    %43 = arith.mulf %40, %28 : vector<16x128xf32>
    %44 = arith.mulf %42, %36 : vector<16x128xf32>
    %45 = arith.addf %43, %44 : vector<16x128xf32>
    %46 = arith.index_cast %32 : i32 to index
    %c0_29 = arith.constant 0 : index
    %47 = vector.load %arg10[%46, %c0_29] : memref<128x128xf32, #tpu.memory_space<vmem>>, vector<16x128xf32>
    tpu.vector_store %arg10[%46, %c0_29], %45 {strides = array<i32>} : memref<128x128xf32, #tpu.memory_space<vmem>>, vector<16x128xf32>,
    %48 = arith.mulf %40, %29 : vector<16x128xf32>
    %49 = arith.addf %48, %42 : vector<16x128xf32>
    %50 = arith.index_cast %32 : i32 to index
    %c0_30 = arith.constant 0 : index
    %51 = vector.load %arg11[%50, %c0_30] : memref<128x128xf32, #tpu.memory_space<vmem>>, vector<16x128xf32>
    tpu.vector_store %arg11[%50, %c0_30], %49 {strides = array<i32>} : memref<128x128xf32, #tpu.memory_space<vmem>>, vector<16x128xf32>,
    %52 = arith.addf %30, %24 : vector<16x128xf32>
    %53 = arith.maximumf %52, %34 : vector<16x128xf32>
    %54 = arith.subf %52, %53 : vector<16x128xf32>
    %55 = math.exp %54 : vector<16x128xf32>
    %56 = arith.subf %34, %53 : vector<16x128xf32>
    %57 = math.exp %56 : vector<16x128xf32>
    %58 = arith.mulf %55, %28 : vector<16x128xf32>
    %59 = arith.mulf %57, %36 : vector<16x128xf32>
    %60 = arith.addf %58, %59 : vector<16x128xf32>
    %61 = arith.mulf %55, %29 : vector<16x128xf32>
    %62 = arith.addf %61, %57 : vector<16x128xf32>
    %c1_i32 = arith.constant 1 : i32
    %c16_i32_31 = arith.constant 16 : i32
    %63 = arith.muli %c1_i32, %c16_i32_31 : i32
    %64 = tpu.assume_multiple %63, 16 : i32
    %65 = arith.index_cast %64 : i32 to index
    %c0_32 = arith.constant 0 : index
    %66 = vector.load %arg9[%65, %c0_32] : memref<128x384xf32, #tpu.memory_space<vmem>>, vector<16x128xf32>
    %67 = arith.index_cast %64 : i32 to index
    %c128_33 = arith.constant 128 : index
    %68 = vector.load %arg9[%67, %c128_33] : memref<128x384xf32, #tpu.memory_space<vmem>>, vector<16x128xf32>
    %69 = arith.addf %27, %66 : vector<16x128xf32>
    %70 = arith.maximumf %53, %69 : vector<16x128xf32>
    %71 = arith.subf %53, %70 : vector<16x128xf32>
    %72 = math.exp %71 : vector<16x128xf32>
    %73 = arith.subf %69, %70 : vector<16x128xf32>
    %74 = math.exp %73 : vector<16x128xf32>
    %75 = arith.mulf %72, %60 : vector<16x128xf32>
    %76 = arith.mulf %74, %68 : vector<16x128xf32>
    %77 = arith.addf %75, %76 : vector<16x128xf32>
    %78 = arith.index_cast %64 : i32 to index
    %c0_34 = arith.constant 0 : index
    %79 = vector.load %arg10[%78, %c0_34] : memref<128x128xf32, #tpu.memory_space<vmem>>, vector<16x128xf32>
    tpu.vector_store %arg10[%78, %c0_34], %77 {strides = array<i32>} : memref<128x128xf32, #tpu.memory_space<vmem>>, vector<16x128xf32>,
    %80 = arith.mulf %72, %62 : vector<16x128xf32>
    %81 = arith.addf %80, %74 : vector<16x128xf32>
    %82 = arith.index_cast %64 : i32 to index
    %c0_35 = arith.constant 0 : index
    %83 = vector.load %arg11[%82, %c0_35] : memref<128x128xf32, #tpu.memory_space<vmem>>, vector<16x128xf32>
    tpu.vector_store %arg11[%82, %c0_35], %81 {strides = array<i32>} : memref<128x128xf32, #tpu.memory_space<vmem>>, vector<16x128xf32>,
    %84 = arith.addf %53, %24 : vector<16x128xf32>
    %85 = arith.maximumf %84, %66 : vector<16x128xf32>
    %86 = arith.subf %84, %85 : vector<16x128xf32>
    %87 = math.exp %86 : vector<16x128xf32>
    %88 = arith.subf %66, %85 : vector<16x128xf32>
    %89 = math.exp %88 : vector<16x128xf32>
    %90 = arith.mulf %87, %60 : vector<16x128xf32>
    %91 = arith.mulf %89, %68 : vector<16x128xf32>
    %92 = arith.addf %90, %91 : vector<16x128xf32>
    %93 = arith.mulf %87, %62 : vector<16x128xf32>
    %94 = arith.addf %93, %89 : vector<16x128xf32>
    %c2_i32 = arith.constant 2 : i32
    %c16_i32_36 = arith.constant 16 : i32
    %95 = arith.muli %c2_i32, %c16_i32_36 : i32
    %96 = tpu.assume_multiple %95, 16 : i32
    %97 = arith.index_cast %96 : i32 to index
    %c0_37 = arith.constant 0 : index
    %98 = vector.load %arg9[%97, %c0_37] : memref<128x384xf32, #tpu.memory_space<vmem>>, vector<16x128xf32>
    %99 = arith.index_cast %96 : i32 to index
    %c128_38 = arith.constant 128 : index
    %100 = vector.load %arg9[%99, %c128_38] : memref<128x384xf32, #tpu.memory_space<vmem>>, vector<16x128xf32>
    %101 = arith.addf %27, %98 : vector<16x128xf32>
    %102 = arith.maximumf %85, %101 : vector<16x128xf32>
    %103 = arith.subf %85, %102 : vector<16x128xf32>
    %104 = math.exp %103 : vector<16x128xf32>
    %105 = arith.subf %101, %102 : vector<16x128xf32>
    %106 = math.exp %105 : vector<16x128xf32>
    %107 = arith.mulf %104, %92 : vector<16x128xf32>
    %108 = arith.mulf %106, %100 : vector<16x128xf32>
    %109 = arith.addf %107, %108 : vector<16x128xf32>
    %110 = arith.index_cast %96 : i32 to index
    %c0_39 = arith.constant 0 : index
    %111 = vector.load %arg10[%110, %c0_39] : memref<128x128xf32, #tpu.memory_space<vmem>>, vector<16x128xf32>
    tpu.vector_store %arg10[%110, %c0_39], %109 {strides = array<i32>} : memref<128x128xf32, #tpu.memory_space<vmem>>, vector<16x128xf32>,
    %112 = arith.mulf %104, %94 : vector<16x128xf32>
    %113 = arith.addf %112, %106 : vector<16x128xf32>
    %114 = arith.index_cast %96 : i32 to index
    %c0_40 = arith.constant 0 : index
    %115 = vector.load %arg11[%114, %c0_40] : memref<128x128xf32, #tpu.memory_space<vmem>>, vector<16x128xf32>
    tpu.vector_store %arg11[%114, %c0_40], %113 {strides = array<i32>} : memref<128x128xf32, #tpu.memory_space<vmem>>, vector<16x128xf32>,
    %116 = arith.addf %85, %24 : vector<16x128xf32>
    %117 = arith.maximumf %116, %98 : vector<16x128xf32>
    %118 = arith.subf %116, %117 : vector<16x128xf32>
    %119 = math.exp %118 : vector<16x128xf32>
    %120 = arith.subf %98, %117 : vector<16x128xf32>
    %121 = math.exp %120 : vector<16x128xf32>
    %122 = arith.mulf %119, %92 : vector<16x128xf32>
    %123 = arith.mulf %121, %100 : vector<16x128xf32>
    %124 = arith.addf %122, %123 : vector<16x128xf32>
    %125 = arith.mulf %119, %94 : vector<16x128xf32>
    %126 = arith.addf %125, %121 : vector<16x128xf32>
    %c3_i32 = arith.constant 3 : i32
    %c16_i32_41 = arith.constant 16 : i32
    %127 = arith.muli %c3_i32, %c16_i32_41 : i32
    %128 = tpu.assume_multiple %127, 16 : i32
    %129 = arith.index_cast %128 : i32 to index
    %c0_42 = arith.constant 0 : index
    %130 = vector.load %arg9[%129, %c0_42] : memref<128x384xf32, #tpu.memory_space<vmem>>, vector<16x128xf32>
    %131 = arith.index_cast %128 : i32 to index
    %c128_43 = arith.constant 128 : index
    %132 = vector.load %arg9[%131, %c128_43] : memref<128x384xf32, #tpu.memory_space<vmem>>, vector<16x128xf32>
    %133 = arith.addf %27, %130 : vector<16x128xf32>
    %134 = arith.maximumf %117, %133 : vector<16x128xf32>
    %135 = arith.subf %117, %134 : vector<16x128xf32>
    %136 = math.exp %135 : vector<16x128xf32>
    %137 = arith.subf %133, %134 : vector<16x128xf32>
    %138 = math.exp %137 : vector<16x128xf32>
    %139 = arith.mulf %136, %124 : vector<16x128xf32>
    %140 = arith.mulf %138, %132 : vector<16x128xf32>
    %141 = arith.addf %139, %140 : vector<16x128xf32>
    %142 = arith.index_cast %128 : i32 to index
    %c0_44 = arith.constant 0 : index
    %143 = vector.load %arg10[%142, %c0_44] : memref<128x128xf32, #tpu.memory_space<vmem>>, vector<16x128xf32>
    tpu.vector_store %arg10[%142, %c0_44], %141 {strides = array<i32>} : memref<128x128xf32, #tpu.memory_space<vmem>>, vector<16x128xf32>,
    %144 = arith.mulf %136, %126 : vector<16x128xf32>
    %145 = arith.addf %144, %138 : vector<16x128xf32>
    %146 = arith.index_cast %128 : i32 to index
    %c0_45 = arith.constant 0 : index
    %147 = vector.load %arg11[%146, %c0_45] : memref<128x128xf32, #tpu.memory_space<vmem>>, vector<16x128xf32>
    tpu.vector_store %arg11[%146, %c0_45], %145 {strides = array<i32>} : memref<128x128xf32, #tpu.memory_space<vmem>>, vector<16x128xf32>,
    %148 = arith.addf %117, %24 : vector<16x128xf32>
    %149 = arith.maximumf %148, %130 : vector<16x128xf32>
    %150 = arith.subf %148, %149 : vector<16x128xf32>
    %151 = math.exp %150 : vector<16x128xf32>
    %152 = arith.subf %130, %149 : vector<16x128xf32>
    %153 = math.exp %152 : vector<16x128xf32>
    %154 = arith.mulf %151, %124 : vector<16x128xf32>
    %155 = arith.mulf %153, %132 : vector<16x128xf32>
    %156 = arith.addf %154, %155 : vector<16x128xf32>
    %157 = arith.mulf %151, %126 : vector<16x128xf32>
    %158 = arith.addf %157, %153 : vector<16x128xf32>
    %c4_i32 = arith.constant 4 : i32
    %c16_i32_46 = arith.constant 16 : i32
    %159 = arith.muli %c4_i32, %c16_i32_46 : i32
    %160 = tpu.assume_multiple %159, 16 : i32
    %161 = arith.index_cast %160 : i32 to index
    %c0_47 = arith.constant 0 : index
    %162 = vector.load %arg9[%161, %c0_47] : memref<128x384xf32, #tpu.memory_space<vmem>>, vector<16x128xf32>
    %163 = arith.index_cast %160 : i32 to index
    %c128_48 = arith.constant 128 : index
    %164 = vector.load %arg9[%163, %c128_48] : memref<128x384xf32, #tpu.memory_space<vmem>>, vector<16x128xf32>
    %165 = arith.addf %27, %162 : vector<16x128xf32>
    %166 = arith.maximumf %149, %165 : vector<16x128xf32>
    %167 = arith.subf %149, %166 : vector<16x128xf32>
    %168 = math.exp %167 : vector<16x128xf32>
    %169 = arith.subf %165, %166 : vector<16x128xf32>
    %170 = math.exp %169 : vector<16x128xf32>
    %171 = arith.mulf %168, %156 : vector<16x128xf32>
    %172 = arith.mulf %170, %164 : vector<16x128xf32>
    %173 = arith.addf %171, %172 : vector<16x128xf32>
    %174 = arith.index_cast %160 : i32 to index
    %c0_49 = arith.constant 0 : index
    %175 = vector.load %arg10[%174, %c0_49] : memref<128x128xf32, #tpu.memory_space<vmem>>, vector<16x128xf32>
    tpu.vector_store %arg10[%174, %c0_49], %173 {strides = array<i32>} : memref<128x128xf32, #tpu.memory_space<vmem>>, vector<16x128xf32>,
    %176 = arith.mulf %168, %158 : vector<16x128xf32>
    %177 = arith.addf %176, %170 : vector<16x128xf32>
    %178 = arith.index_cast %160 : i32 to index
    %c0_50 = arith.constant 0 : index
    %179 = vector.load %arg11[%178, %c0_50] : memref<128x128xf32, #tpu.memory_space<vmem>>, vector<16x128xf32>
    tpu.vector_store %arg11[%178, %c0_50], %177 {strides = array<i32>} : memref<128x128xf32, #tpu.memory_space<vmem>>, vector<16x128xf32>,
    %180 = arith.addf %149, %24 : vector<16x128xf32>
    %181 = arith.maximumf %180, %162 : vector<16x128xf32>
    %182 = arith.subf %180, %181 : vector<16x128xf32>
    %183 = math.exp %182 : vector<16x128xf32>
    %184 = arith.subf %162, %181 : vector<16x128xf32>
    %185 = math.exp %184 : vector<16x128xf32>
    %186 = arith.mulf %183, %156 : vector<16x128xf32>
    %187 = arith.mulf %185, %164 : vector<16x128xf32>
    %188 = arith.addf %186, %187 : vector<16x128xf32>
    %189 = arith.mulf %183, %158 : vector<16x128xf32>
    %190 = arith.addf %189, %185 : vector<16x128xf32>
    %c5_i32 = arith.constant 5 : i32
    %c16_i32_51 = arith.constant 16 : i32
    %191 = arith.muli %c5_i32, %c16_i32_51 : i32
    %192 = tpu.assume_multiple %191, 16 : i32
    %193 = arith.index_cast %192 : i32 to index
    %c0_52 = arith.constant 0 : index
    %194 = vector.load %arg9[%193, %c0_52] : memref<128x384xf32, #tpu.memory_space<vmem>>, vector<16x128xf32>
    %195 = arith.index_cast %192 : i32 to index
    %c128_53 = arith.constant 128 : index
    %196 = vector.load %arg9[%195, %c128_53] : memref<128x384xf32, #tpu.memory_space<vmem>>, vector<16x128xf32>
    %197 = arith.addf %27, %194 : vector<16x128xf32>
    %198 = arith.maximumf %181, %197 : vector<16x128xf32>
    %199 = arith.subf %181, %198 : vector<16x128xf32>
    %200 = math.exp %199 : vector<16x128xf32>
    %201 = arith.subf %197, %198 : vector<16x128xf32>
    %202 = math.exp %201 : vector<16x128xf32>
    %203 = arith.mulf %200, %188 : vector<16x128xf32>
    %204 = arith.mulf %202, %196 : vector<16x128xf32>
    %205 = arith.addf %203, %204 : vector<16x128xf32>
    %206 = arith.index_cast %192 : i32 to index
    %c0_54 = arith.constant 0 : index
    %207 = vector.load %arg10[%206, %c0_54] : memref<128x128xf32, #tpu.memory_space<vmem>>, vector<16x128xf32>
    tpu.vector_store %arg10[%206, %c0_54], %205 {strides = array<i32>} : memref<128x128xf32, #tpu.memory_space<vmem>>, vector<16x128xf32>,
    %208 = arith.mulf %200, %190 : vector<16x128xf32>
    %209 = arith.addf %208, %202 : vector<16x128xf32>
    %210 = arith.index_cast %192 : i32 to index
    %c0_55 = arith.constant 0 : index
    %211 = vector.load %arg11[%210, %c0_55] : memref<128x128xf32, #tpu.memory_space<vmem>>, vector<16x128xf32>
    tpu.vector_store %arg11[%210, %c0_55], %209 {strides = array<i32>} : memref<128x128xf32, #tpu.memory_space<vmem>>, vector<16x128xf32>,
    %212 = arith.addf %181, %24 : vector<16x128xf32>
    %213 = arith.maximumf %212, %194 : vector<16x128xf32>
    %214 = arith.subf %212, %213 : vector<16x128xf32>
    %215 = math.exp %214 : vector<16x128xf32>
    %216 = arith.subf %194, %213 : vector<16x128xf32>
    %217 = math.exp %216 : vector<16x128xf32>
    %218 = arith.mulf %215, %188 : vector<16x128xf32>
    %219 = arith.mulf %217, %196 : vector<16x128xf32>
    %220 = arith.addf %218, %219 : vector<16x128xf32>
    %221 = arith.mulf %215, %190 : vector<16x128xf32>
    %222 = arith.addf %221, %217 : vector<16x128xf32>
    %c6_i32 = arith.constant 6 : i32
    %c16_i32_56 = arith.constant 16 : i32
    %223 = arith.muli %c6_i32, %c16_i32_56 : i32
    %224 = tpu.assume_multiple %223, 16 : i32
    %225 = arith.index_cast %224 : i32 to index
    %c0_57 = arith.constant 0 : index
    %226 = vector.load %arg9[%225, %c0_57] : memref<128x384xf32, #tpu.memory_space<vmem>>, vector<16x128xf32>
    %227 = arith.index_cast %224 : i32 to index
    %c128_58 = arith.constant 128 : index
    %228 = vector.load %arg9[%227, %c128_58] : memref<128x384xf32, #tpu.memory_space<vmem>>, vector<16x128xf32>
    %229 = arith.addf %27, %226 : vector<16x128xf32>
    %230 = arith.maximumf %213, %229 : vector<16x128xf32>
    %231 = arith.subf %213, %230 : vector<16x128xf32>
    %232 = math.exp %231 : vector<16x128xf32>
    %233 = arith.subf %229, %230 : vector<16x128xf32>
    %234 = math.exp %233 : vector<16x128xf32>
    %235 = arith.mulf %232, %220 : vector<16x128xf32>
    %236 = arith.mulf %234, %228 : vector<16x128xf32>
    %237 = arith.addf %235, %236 : vector<16x128xf32>
    %238 = arith.index_cast %224 : i32 to index
    %c0_59 = arith.constant 0 : index
    %239 = vector.load %arg10[%238, %c0_59] : memref<128x128xf32, #tpu.memory_space<vmem>>, vector<16x128xf32>
    tpu.vector_store %arg10[%238, %c0_59], %237 {strides = array<i32>} : memref<128x128xf32, #tpu.memory_space<vmem>>, vector<16x128xf32>,
    %240 = arith.mulf %232, %222 : vector<16x128xf32>
    %241 = arith.addf %240, %234 : vector<16x128xf32>
    %242 = arith.index_cast %224 : i32 to index
    %c0_60 = arith.constant 0 : index
    %243 = vector.load %arg11[%242, %c0_60] : memref<128x128xf32, #tpu.memory_space<vmem>>, vector<16x128xf32>
    tpu.vector_store %arg11[%242, %c0_60], %241 {strides = array<i32>} : memref<128x128xf32, #tpu.memory_space<vmem>>, vector<16x128xf32>,
    %244 = arith.addf %213, %24 : vector<16x128xf32>
    %245 = arith.maximumf %244, %226 : vector<16x128xf32>
    %246 = arith.subf %244, %245 : vector<16x128xf32>
    %247 = math.exp %246 : vector<16x128xf32>
    %248 = arith.subf %226, %245 : vector<16x128xf32>
    %249 = math.exp %248 : vector<16x128xf32>
    %250 = arith.mulf %247, %220 : vector<16x128xf32>
    %251 = arith.mulf %249, %228 : vector<16x128xf32>
    %252 = arith.addf %250, %251 : vector<16x128xf32>
    %253 = arith.mulf %247, %222 : vector<16x128xf32>
    %254 = arith.addf %253, %249 : vector<16x128xf32>
    %c7_i32 = arith.constant 7 : i32
    %c16_i32_61 = arith.constant 16 : i32
    %255 = arith.muli %c7_i32, %c16_i32_61 : i32
    %256 = tpu.assume_multiple %255, 16 : i32
    %257 = arith.index_cast %256 : i32 to index
    %c0_62 = arith.constant 0 : index
    %258 = vector.load %arg9[%257, %c0_62] : memref<128x384xf32, #tpu.memory_space<vmem>>, vector<16x128xf32>
    %259 = arith.index_cast %256 : i32 to index
    %c128_63 = arith.constant 128 : index
    %260 = vector.load %arg9[%259, %c128_63] : memref<128x384xf32, #tpu.memory_space<vmem>>, vector<16x128xf32>
    %261 = arith.addf %27, %258 : vector<16x128xf32>
    %262 = arith.maximumf %245, %261 : vector<16x128xf32>
    %263 = arith.subf %245, %262 : vector<16x128xf32>
    %264 = math.exp %263 : vector<16x128xf32>
    %265 = arith.subf %261, %262 : vector<16x128xf32>
    %266 = math.exp %265 : vector<16x128xf32>
    %267 = arith.mulf %264, %252 : vector<16x128xf32>
    %268 = arith.mulf %266, %260 : vector<16x128xf32>
    %269 = arith.addf %267, %268 : vector<16x128xf32>
    %270 = arith.index_cast %256 : i32 to index
    %c0_64 = arith.constant 0 : index
    %271 = vector.load %arg10[%270, %c0_64] : memref<128x128xf32, #tpu.memory_space<vmem>>, vector<16x128xf32>
    tpu.vector_store %arg10[%270, %c0_64], %269 {strides = array<i32>} : memref<128x128xf32, #tpu.memory_space<vmem>>, vector<16x128xf32>,
    %272 = arith.mulf %264, %254 : vector<16x128xf32>
    %273 = arith.addf %272, %266 : vector<16x128xf32>
    %274 = arith.index_cast %256 : i32 to index
    %c0_65 = arith.constant 0 : index
    %275 = vector.load %arg11[%274, %c0_65] : memref<128x128xf32, #tpu.memory_space<vmem>>, vector<16x128xf32>
    tpu.vector_store %arg11[%274, %c0_65], %273 {strides = array<i32>} : memref<128x128xf32, #tpu.memory_space<vmem>>, vector<16x128xf32>,
    %276 = arith.addf %245, %24 : vector<16x128xf32>
    %277 = arith.maximumf %276, %258 : vector<16x128xf32>
    %278 = arith.subf %276, %277 : vector<16x128xf32>
    %279 = math.exp %278 : vector<16x128xf32>
    %280 = arith.subf %258, %277 : vector<16x128xf32>
    %281 = math.exp %280 : vector<16x128xf32>
    %282 = arith.mulf %279, %252 : vector<16x128xf32>
    %283 = arith.mulf %281, %260 : vector<16x128xf32>
    %284 = arith.addf %282, %283 : vector<16x128xf32>
    %285 = arith.mulf %279, %254 : vector<16x128xf32>
    %286 = arith.addf %285, %281 : vector<16x128xf32>
    %c8_i32 = arith.constant 8 : i32
    %c0_66 = arith.constant 0 : index
    %c0_67 = arith.constant 0 : index
    %287 = vector.load %arg12[%c0_66, %c0_67] : memref<16x128xf32, #tpu.memory_space<vmem>>, vector<16x128xf32>
    tpu.vector_store %arg12[%c0_66, %c0_67], %284 {strides = array<i32>} : memref<16x128xf32, #tpu.memory_space<vmem>>, vector<16x128xf32>,
    %c0_68 = arith.constant 0 : index
    %c0_69 = arith.constant 0 : index
    %288 = vector.load %arg13[%c0_68, %c0_69] : memref<16x128xf32, #tpu.memory_space<vmem>>, vector<16x128xf32>
    tpu.vector_store %arg13[%c0_68, %c0_69], %286 {strides = array<i32>} : memref<16x128xf32, #tpu.memory_space<vmem>>, vector<16x128xf32>,
    %c0_70 = arith.constant 0 : index
    %c0_71 = arith.constant 0 : index
    %289 = vector.load %arg14[%c0_70, %c0_71] : memref<16x128xf32, #tpu.memory_space<vmem>>, vector<16x128xf32>
    tpu.vector_store %arg14[%c0_70, %c0_71], %277 {strides = array<i32>} : memref<16x128xf32, #tpu.memory_space<vmem>>, vector<16x128xf32>,
    %c0_72 = arith.constant 0 : index
    %c256 = arith.constant 256 : index
    %290 = vector.load %arg9[%c0_72, %c256] : memref<128x384xf32, #tpu.memory_space<vmem>>, vector<128x128xf32>
    %291 = arith.negf %290 : vector<128x128xf32>
    %292 = math.exp %291 : vector<128x128xf32>
    %cst_73 = arith.constant 1.000000e+00 : f32
    %293 = vector.broadcast %cst_73 : f32 to vector<128x128xf32>
    %294 = arith.addf %293, %292 : vector<128x128xf32>
    %295 = arith.divf %293, %294 : vector<128x128xf32>
    %c0_74 = arith.constant 0 : index
    %c0_75 = arith.constant 0 : index
    %296 = vector.load %arg10[%c0_74, %c0_75] : memref<128x128xf32, #tpu.memory_space<vmem>>, vector<128x128xf32>
    %c0_76 = arith.constant 0 : index
    %c0_77 = arith.constant 0 : index
    %297 = vector.load %arg11[%c0_76, %c0_77] : memref<128x128xf32, #tpu.memory_space<vmem>>, vector<128x128xf32>
    %298 = tpu.reciprocal %297 {approx = true} : vector<128x128xf32> -> vector<128x128xf32>
    %299 = arith.mulf %296, %298 : vector<128x128xf32>
    %300 = arith.mulf %295, %299 : vector<128x128xf32>
    %301 = arith.truncf %300 : vector<128x128xf32> to vector<128x128xbf16>
    %c0_78 = arith.constant 0 : index
    %c0_79 = arith.constant 0 : index
    %302 = vector.load %arg5[%c0_78, %c0_79] : memref<128x128xbf16, #tpu.memory_space<vmem>>, vector<128x128xbf16>
    %cst_80 = arith.constant dense<0.000000e+00> : vector<128x128xf32>
    %303 = tpu.matmul %301, %302, %cst_80 {dimension_numbers = #tpu.dot_dimension_numbers<[1], [0], [0], [1], [0, 0, 1, 1], [], []>} : vector<128x128xbf16>, vector<128x128xbf16>, vector<128x128xf32> -> vector<128x128xf32>
    %304 = vector.shape_cast %303 : vector<128x128xf32> to vector<1x8x16x128xf32>
    %c0_81 = arith.constant 0 : index
    %c0_82 = arith.constant 0 : index
    %c0_83 = arith.constant 0 : index
    %c0_84 = arith.constant 0 : index
    %305 = vector.load %arg8[%c0_81, %c0_82, %c0_83, %c0_84] : memref<1x8x16x128xf32, #tpu.memory_space<vmem>>, vector<1x8x16x128xf32>
    tpu.vector_store %arg8[%c0_81, %c0_82, %c0_83, %c0_84], %304 {strides = array<i32>} : memref<1x8x16x128xf32, #tpu.memory_space<vmem>>, vector<1x8x16x128xf32>,
    return
  }
  func.func @transform_0(%arg0: i32, %arg1: i32) -> (i32, i32, i32, i32) {
    %c0_i32 = arith.constant 0 : i32
    %c0_i32_0 = arith.constant 0 : i32
    %c0_i32_1 = arith.constant 0 : i32
    return %arg0, %arg1, %c0_i32, %c0_i32_0 : i32, i32, i32, i32
  }
  func.func @transform_1(%arg0: i32, %arg1: i32) -> (i32, i32) {
    %c0_i32 = arith.constant 0 : i32
    %c0_i32_0 = arith.constant 0 : i32
    %c0_i32_1 = arith.constant 0 : i32
    return %c0_i32, %c0_i32_0 : i32, i32
  }
  func.func @transform_2(%arg0: i32, %arg1: i32) -> (i32, i32) {
    %c0_i32 = arith.constant 0 : i32
    %c0_i32_0 = arith.constant 0 : i32
    %c0_i32_1 = arith.constant 0 : i32
    return %c0_i32, %c0_i32_0 : i32, i32
  }
  func.func @transform_3(%arg0: i32, %arg1: i32) -> (i32, i32) {
    %c0_i32 = arith.constant 0 : i32
    %c0_i32_0 = arith.constant 0 : i32
    %c0_i32_1 = arith.constant 0 : i32
    return %c0_i32, %c0_i32_0 : i32, i32
  }
  func.func @transform_4(%arg0: i32, %arg1: i32) -> (i32, i32) {
    %c0_i32 = arith.constant 0 : i32
    %c0_i32_0 = arith.constant 0 : i32
    %c0_i32_1 = arith.constant 0 : i32
    return %c0_i32, %c0_i32_0 : i32, i32
  }
  func.func @transform_5(%arg0: i32, %arg1: i32) -> (i32, i32) {
    %c0_i32 = arith.constant 0 : i32
    %c0_i32_0 = arith.constant 0 : i32
    %c0_i32_1 = arith.constant 0 : i32
    return %c0_i32, %c0_i32_0 : i32, i32
  }
  func.func @transform_6(%arg0: i32, %arg1: i32) -> (i32, i32, i32, i32) {
    %c0_i32 = arith.constant 0 : i32
    %c0_i32_0 = arith.constant 0 : i32
    %c0_i32_1 = arith.constant 0 : i32
    return %arg0, %arg1, %c0_i32, %c0_i32_0 : i32, i32, i32, i32
  }
}

</mosaic_0001>

<bundles_post_ra>
// kernel: tpu_custom_call.1
= control target key start
LH: loop header
LB: loop body
LE: loop exit
PB: predicated region body
PF: predicated region fallthrough
CT: control target
= control target key end

     0   :  { %s4162_s0 = inlined_call_operand.hbm [shape: bf16[2,16,16,128], index: 0, kind: input, shape index: {}]   ;;  %s4163_s1 = inlined_call_operand.hbm [shape: bf16[128,384], index: 1, kind: input, shape index: {}]   ;;  %s4164_s2 = inlined_call_operand.hbm [shape: bf16[128,384], index: 2, kind: input, shape index: {}]   ;;  %s4165_s3 = inlined_call_operand.hbm [shape: bf16[128,128], index: 3, kind: input, shape index: {}]   ;;  %s4166_s4 = inlined_call_operand.vmem [shape: f32[1,128], index: 4, kind: input, shape index: {}]   ;;  %s4167_s5 = inlined_call_operand.vmem [shape: f32[1,128], index: 5, kind: input, shape index: {}]   ;;  %s4168_s6 = inlined_call_operand.hbm [shape: f32[2,16,16,128], index: 6, kind: output, shape index: {}]  }
   0x1   :  { %4180 = sst [smem:[#allocation43_spill]] %s4163_s1 }
   0x2   :  { %4181 = sst [smem:[#allocation44_spill]] %s4164_s2 }
   0x3   :  { %4182 = sst [smem:[#allocation45_spill]] %s4165_s3 }
   0x4   :  { %4183 = sst [smem:[#allocation46_spill]] %s4168_s6 }
   0x5   :  { %11 = vsyncpa [#allocation10], 0 }
   0x6   :  { %13 = vsyncpa [#allocation10 + $0x1], 0 }
   0x7   :  { %14 = vsyncpa [#allocation13], 0 }
   0x8   :  { %15 = vsyncpa [#allocation16], 0 }
   0x9   :  { %16 = vsyncpa [#allocation11], 0 }
   0xa   :  { %18 = vsyncpa [#allocation11 + $0x1], 0  ;;  %s3286_s21 = smov 0   ;;  %s3288_s22 = smov 0  }
   0xb   :  { %s3290_s23 = smov 0   ;;  %s3292_s24 = smov 0  }
   0xc   :  { %s3294_s25 = smov 0   ;;  %s3296_s26 = smov 0  }
   0xd   :  { %s3298_s27 = smov 0   ;;  %s3300_s28 = smov 0  }
   0xe LB: > { %4184 = sst [smem:[#allocation22_spill]] %s3207_s21  ;;  %s2331_s29 = sadd.s32 4294967295, %s3235_s28   ;;  %s3235_s28 = sphi %s3300_s28, %s24_s28   ;;  %s3231_s27 = sphi %s3298_s27, %s4250_s27   ;;  %s3227_s26 = sphi %s3296_s26, %s4245_s26   ;;  %s3223_s25 = sphi %s3294_s25, %s4249_s25   ;;  %s3219_s24 = sphi %s3292_s24, %s4244_s24   ;;  %s3215_s23 = sphi %s3290_s23, %s4248_s23   ;;  %s3211_s22 = sphi %s3288_s22, %s4247_s22   ;;  %s3207_s21 = sphi %s3286_s21, %s4246_s21  }
   0xf   : > { %4185 = sst [smem:[#allocation23_spill]] %s3227_s26  ;;  %s2332_s30 = sadd.s32 4294967294, %s3235_s28  }
  0x10   : > { %p58_p0 = scmp.ne.s32.totalorder %s3211_s22, %s3207_s21  ;;  %p3330_p1 = scmp.eq.s32.totalorder %s2331_s29, 0 }
  0x11   : > { %p3334_p2 = scmp.eq.s32.totalorder %s2331_s29, 3  ;;  %p195_p3 = scmp.eq.s32.totalorder %s2332_s30, 3 }
  0x12   : > { %s4186_s7 = scalar_select %p3330_p1, 1, 0 }
  0x13   : > { %p3340_p4 = por %p3330_p1, %p58_p0  ;;  %p2333_p5 = scmp.ge.s32.totalorder %s3235_s28, 1 }
  0x14   : > { %p3345_p6 = por %p195_p3, %p58_p0  ;;  %p202_p7 = scmp.lt.s32.totalorder %s3235_s28, 5 }
  0x15   : > { %s4188_s9 = scalar_select %p3340_p4, 1, 0 }
  0x16   : > { %s4189_s10 = scalar_select %p3345_p6, 1, 0 }
  0x17   : > { %p3350_p8 = pnand %p2333_p5, %p202_p7  ;;  %s3237_s12 = smov [#allocation12]  }
  0x18   : > { %4190 = sst [smem:[#allocation24_spill]] %s4189_s10  ;;  %s214_s13 = sshll.u32 %s3237_s12, 4  ;;  %s215_s13 = int_to_ptr.vmem [resolvable:$true] %s214_s13 }
  0x19   : > { %s4191_s11 = scalar_select %p3350_p8, 1, 0 }
  0x1a   : > { %p2616_p9 = pneg %p3350_p8  ;;  %s3238_s15 = smov [#allocation14]  }
  0x1b   : > { %s227_s16 = sshll.u32 %s3238_s15, 4  ;;  %s3239_s17 = smov [#allocation15]   ;;  %s228_s16 = int_to_ptr.vmem [resolvable:$true] %s227_s16 }
  0x1c   : > { %p3358_p10 = pnand %p2616_p9, %p3330_p1  ;;  %s240_s18 = sshll.u32 %s3239_s17, 4  ;;  %s241_s18 = int_to_ptr.vmem [resolvable:$true] %s240_s18 }
  0x1d   : > { %s3036_s19 = scalar_lea.vmem %s215_s13, 3072  ;;  %p3044_p3 = scmp.lt.s32.totalorder %s215_s13, %s215_s13 }
  0x1e   : > { %p3027_p11 = pneg %p3358_p10  ;;  %p3037_p12 = scmp.ne.s32.totalorder %s215_s13, %s3036_s19 }
  0x1f   : > { %p3045_p5 = scmp.lt.s32.totalorder %s3036_s19, %s3036_s19 }
  0x20   : > { %p3039_p13 = pnand %p3037_p12, %p3027_p11 }
  0x21   : > { %p3046_p7 = por %p3045_p5, %p3044_p3 }
  0x22   : > { %p3040_p0 = pneg %p3039_p13 }
  0x24   : > { %p3047_p9 = pnand %p3046_p7, %p3040_p0 }
  0x26   : > { %3050 = shalt.err (!%p3047_p9)
}
  0x27   : > { %s3240_s20 = smov 192   ;;  %s3241_s29 = smov 12  }
  0x28   : > { %s4193_s1 = sld [smem:[#allocation43_spill]]  ;;  %s3062_s15 = scalar_lea.vmem %s228_s16, 3072 }
  0x29   : > { %p3063_p6 = scmp.ne.s32.totalorder %s228_s16, %s3062_s15  ;;  %p3070_p1 = scmp.lt.s32.totalorder %s228_s16, %s228_s16 }
  0x2a   : > { %p3071_p4 = scmp.lt.s32.totalorder %s3062_s15, %s3062_s15 }
  0x2b   : > { %p3065_p12 = pnand %p3063_p6, %p3027_p11 }
  0x2c   : > { %p3072_p3 = por %p3071_p4, %p3070_p1 }
  0x2d   : > { %p3066_p13 = pneg %p3065_p12 }
  0x2e   : > { %2619 = dma.hbm_to_vmem [thread:$0]  (!%p3358_p10), %s4193_s1, 3072, %s215_s13, [#allocation13], %s3240_s20, %s3240_s20, %s3241_s29  }
  0x2f   : > { %p3073_p0 = pnand %p3072_p3, %p3066_p13 }
  0x31   : > { %3076 = shalt.err (!%p3073_p0)
}
  0x32   : > { %s4194_s2 = sld [smem:[#allocation44_spill]]  ;;  %s3088_s13 = scalar_lea.vmem %s241_s18, 1024 }
  0x33   : > { %p3089_p5 = scmp.ne.s32.totalorder %s241_s18, %s3088_s13  ;;  %p3096_p9 = scmp.lt.s32.totalorder %s241_s18, %s241_s18 }
  0x34   : > { %p3097_p12 = scmp.lt.s32.totalorder %s3088_s13, %s3088_s13 }
  0x35   : > { %p3091_p7 = pnand %p3089_p5, %p3027_p11 }
  0x36   : > { %p3098_p8 = por %p3097_p12, %p3096_p9 }
  0x37   : > { %p3092_p6 = pneg %p3091_p7 }
  0x38   : > { %2622 = dma.hbm_to_vmem [thread:$0]  (!%p3358_p10), %s4194_s2, 3072, %s228_s16, [#allocation13], %s3240_s20, %s3240_s20, %s3241_s29  }
  0x39   : > { %p3099_p1 = pnand %p3098_p8, %p3092_p6 }
  0x3b   : > { %3102 = shalt.err (!%p3099_p1)
}
  0x3c   : > { %s4173_s30 = smov 64   ;;  %s4174_s16 = smov 4  }
  0x3d   : > { %s4195_s3 = sld [smem:[#allocation45_spill]]  ;;  %s33_s12 = sadd.s32 1, %s3227_s26 }
  0x3e   : > { %p34_p4 = scmp.ge.s32.totalorder %s33_s12, 2  ;;  %s36_s15 = sadd.s32 1, %s3231_s27 }
  0x3f   : > { %s45_s17 = sadd.s32 1, %s3215_s23  ;;  %p52_p8 = scmp.ne.s32.totalorder %s3215_s23, %s3211_s22 }
  0x40   : > { %s4252_s12 = smov (%p34_p4, %s33_s12), 0  ;;  %s4254_s15 = smov (!%p34_p4, %s36_s15), %s3231_s27 }
  0x41   : > { %4196 = sst [smem:[#allocation25_spill]] %s4252_s12  ;;  %s41_s14 = ssub.s32 %s3227_s26, %s4252_s12 }
  0x42   : > { %p53_p11 = scmp.eq.s32.totalorder %s3235_s28, 0  ;;  %p38_p13 = scmp.ge.s32.totalorder %s4254_s15, 2 }
  0x43   : > { %2625 = dma.hbm_to_vmem [thread:$0]  (!%p3358_p10), %s4195_s3, 1024, %s241_s18, [#allocation16], %s4173_s30, %s4173_s30, %s4174_s16  }
  0x44   : > { %p3404_p3 = por %p3334_p2, %p52_p8  ;;  %p3408_p10 = por %p53_p11, %p52_p8 }
  0x45   : > { %p2637_p0 = scmp.lt.s32.totalorder %s3235_s28, 4  ;;  %s4256_s15 = smov (%p38_p13, %s4254_s15), 0 }
  0x46   : > { %s260_s13 = sand.u32 1, %s3215_s23   ;;  %s2438_s20 = sshll.u32 %s3227_s26, 4 }
  0x47   : > { %s40_s29 = ssub.s32 %s3231_s27, %s4256_s15  ;;  %s2338_s16 = sshll.u32 %s260_s13, 6 }
  0x48   : > { %s42_s30 = sor.u32 %s41_s14, %s40_s29  ;;  %s2341_s8 = sshll.u32 %s3231_s27, 5 }
  0x49   : > { %p43_p5 = scmp.eq.s32.totalorder %s42_s30, 0  ;;  %s264_s1 = scalar_lea.vmem [#allocation9], %s2338_s16 }
  0x4a   : > { %s274_s2 = sshll.u32 %s264_s1, 4  ;;  %s271_s12 = sadd.s32 %s2438_s20, %s2341_s8  ;;  %s275_s2 = int_to_ptr.vmem [resolvable:$true] %s274_s2 }
  0x4b   : > { %s3421_s3 = scalar_select %p43_p5, %s3215_s23, %s45_s17  }
  0x4c   : > { %s2342_s10 = sshll.u32 %s271_s12, 6  ;;  %p3427_p2 = pnand %p2637_p0, %p3408_p10 }
  0x4d   : > { %s273_s14 = scalar_lea.hbm %s4162_s0, %s2342_s10  ;;  %s261_s30 = scalar_lea.sflag [#allocation10], %s260_s13 }
  0x4e   : > { %p3105_p7 = pneg %p3427_p2  ;;  %s3116_s1 = scalar_lea.vmem %s275_s2, 1024 }
  0x4f   : > { %p3117_p6 = scmp.ne.s32.totalorder %s275_s2, %s3116_s1  ;;  %s3244_s16 = smov [#allocation9]  }
  0x50   : > { %s3121_s12 = sshll.u32 %s3244_s16, 4  ;;  %s3122_s12 = int_to_ptr.vmem [resolvable:$false] %s3121_s12 }
  0x51   : > { %p3119_p9 = pnand %p3117_p6, %p3105_p7  ;;  %s3123_s17 = scalar_lea.vmem %s3122_s12, 2048 }
  0x52   : > { %p3124_p1 = scmp.lt.s32.totalorder %s275_s2, %s3122_s12  ;;  %p3125_p4 = scmp.lt.s32.totalorder %s3123_s17, %s3116_s1 }
  0x53   : > { %p3120_p12 = pneg %p3119_p9 }
  0x54   : > { %p3126_p8 = por %p3125_p4, %p3124_p1 }
  0x56   : > { %p3127_p11 = pnand %p3126_p8, %p3120_p12 }
  0x58   : > { %3130 = shalt.err (!%p3127_p11)
}
  0x59   : > { %s4200_s6 = smov 4   ;;  %s4201_s26 = smov 64  }
  0x5a   : > { %2629 = dma.hbm_to_vmem [thread:$0]  (!%p3427_p2), %s273_s14, 1024, %s275_s2, %s261_s30, %s4201_s26, %s4201_s26, %s4200_s6  }
  0x5b   : > { %p4202_p13 = scmp.ne.s32.totalorder %s4191_s11, 0 }
  0x5d   : > { %286 = sbr.rel (%p4202_p13) target bundleno = 756 (0x2f4), region = 44 }
  0x62   : > { %s3444_s10 = sand.u32 1, %s3211_s22   ;;  %p4203_p10 = scmp.ne.s32.totalorder %s4188_s9, 0 }
  0x63   : > { %s2344_s18 = sshll.u32 %s3444_s10, 6  ;;  %s289_s13 = scalar_lea.sflag [#allocation10], %s3444_s10 }
  0x64   : > { %s3448_s20 = scalar_lea.vmem [#allocation9], %s2344_s18 }
  0x65   : > { %3190 = dma.done.wait (%p4203_p10), %s289_s13, 1024  }
  0x66   : > { %3192 = vsyncadd (%p4203_p10), %s289_s13, 4294966272  ;;  %p4204_p0 = scmp.ne.s32.totalorder %s4186_s7, 0 }
  0x68   : > { %3194 = dma.done.wait (%p4204_p0), [#allocation13], 6144  }
  0x69   : > { %3196 = vsyncadd (%p4204_p0), [#allocation13], 4294961152 }
  0x6a   : > { %3198 = dma.done.wait (%p4204_p0), [#allocation16], 1024  }
  0x6b   : > { %3200 = vsyncadd (%p4204_p0), [#allocation16], 4294966272  ;;  %s2348_s2 = sshll.u32 %s3444_s10, 7  ;;  %p2349_p5 = scmp.ne.s32.totalorder %s3219_s24, 0 }
  0x6c   : > { %s3463_s21 = scalar_lea.vmem [#allocation17], %s2348_s2 }
  0x6d   : > { %339 = sbr.rel (%p2349_p5) target bundleno = 121 (0x79), region = 64 }
  0x72   : > { %v3245_v0 = vmov 0.0   ;;  %v3246_v1 = vmov -1e+38  }
  0x73   : > { %340 = vst [vmem:[#allocation5] sm:$0xff] %v3245_v0  ;;  %341 = vst [vmem:[#allocation5 + $0x8] sm:$0xff] %v3245_v0 }
  0x74   : > { %342 = vst [vmem:[#allocation6 + $0x8] sm:$0xff] %v3245_v0  ;;  %343 = vst [vmem:[#allocation6] sm:$0xff] %v3245_v0 }
  0x75   : > { %346 = vst [vmem:[#allocation8] sm:$0xff] %v3245_v0  ;;  %347 = vst [vmem:[#allocation8 + $0x8] sm:$0xff] %v3245_v0 }
  0x76   : > { %348 = vst [vmem:[#allocation8 + $0x10] sm:$0xff] %v3245_v0  ;;  %349 = vst [vmem:[#allocation8 + $0x28] sm:$0xff] %v3245_v0 }
  0x77   : > { %350 = vst [vmem:[#allocation8 + $0x20] sm:$0xff] %v3245_v0  ;;  %351 = vst [vmem:[#allocation8 + $0x18] sm:$0xff] %v3245_v0 }
  0x78   : > { %344 = vst [vmem:[#allocation7 + $0x8] sm:$0xff] %v3246_v1  ;;  %345 = vst [vmem:[#allocation7] sm:$0xff] %v3246_v1 }
  0x79 PF: > { %v2718_v2 = vld [vmem:[#allocation12 + $0xac] ss:$12 sps:$4 sm:$0xff]   ;;  %v2720_v3 = vld [vmem:[#allocation12 + $0xb0] ss:$12 sps:$4 sm:$0xff]   ;;  %v3247_v4 = vmov 0   ;;  %v3468_v20 = vld [vmem:[%s3448_s20] sm:$0xff]   ;;  %v1269_v62 = vlaneseq }
  0x7a   : > { %608 = vmatprep.mubr.bf16.mxu0 %v3247_v4  ;;  %576 = vmatprep.subr.bf16.mxu0 %v2718_v2  ;;  %v2721_v5 = vld [vmem:[#allocation12 + $0xa8] ss:$12 sps:$4 sm:$0xff]   ;;  %v2724_v7 = vld [vmem:[#allocation12 + $0x98] ss:$12 sps:$4 sm:$0xff]   ;;  %v2725_v8 = vld [vmem:[#allocation12 + $0x90] ss:$12 sps:$4 sm:$0xff]  }
  0x7b   : > { %2488 = vmatprep.subr.bf16.mxu1 %v2720_v3  ;;  %v2722_v6 = vld [vmem:[#allocation12 + $0x94] ss:$12 sps:$4 sm:$0xff]   ;;  %577 = vmatpush1.bf16.msra.mxu0 %v2721_v5  ;;  %v2726_v9 = vld [vmem:[#allocation12 + $0x7c] ss:$12 sps:$4 sm:$0xff]   ;;  %v2729_v11 = vld [vmem:[#allocation12 + $0x78] ss:$12 sps:$4 sm:$0xff]  }
  0x7c   : > { %2489 = vmatpush3.bf16.msra.mxu1 %v2720_v3  ;;  %578 = vmatprep.subr.bf16.mxu0 %v2722_v6  ;;  %v2728_v10 = vld [vmem:[#allocation12 + $0x80] ss:$12 sps:$4 sm:$0xff]   ;;  %v2730_v12 = vld [vmem:[#allocation12 + $0x64] ss:$12 sps:$4 sm:$0xff]   ;;  %v2732_v13 = vld [vmem:[#allocation12 + $0x68] ss:$12 sps:$4 sm:$0xff]  }
  0x7d   : > { %2490 = vmatprep.subr.bf16.mxu1 %v2724_v7  ;;  %v2733_v14 = vld [vmem:[#allocation12 + $0x60] ss:$12 sps:$4 sm:$0xff]   ;;  %v2736_v16 = vld [vmem:[#allocation12 + $0x50] ss:$12 sps:$4 sm:$0xff]   ;;  %v2737_v17 = vld [vmem:[#allocation12 + $0x48] ss:$12 sps:$4 sm:$0xff]   ;;  %2504 = vmatprep.mubr.bf16.mxu1 %v3468_v20 }
  0x7e   : > { %v2734_v15 = vld [vmem:[#allocation12 + $0x4c] ss:$12 sps:$4 sm:$0xff]   ;;  %v2738_v18 = vld [vmem:[#allocation12 + $0x34] ss:$12 sps:$4 sm:$0xff]   ;;  %v2741_v21 = vld [vmem:[#allocation12 + $0x30] ss:$12 sps:$4 sm:$0xff]  }
  0x7f   : > { %579 = vmatpush1.bf16.msra.mxu0 %v2725_v8  ;;  %v2740_v19 = vld [vmem:[#allocation12 + $0x38] ss:$12 sps:$4 sm:$0xff]   ;;  %v2742_v22 = vld [vmem:[#allocation12 + $0x1c] ss:$12 sps:$4 sm:$0xff]   ;;  %v2744_v23 = vld [vmem:[#allocation12 + $0x20] ss:$12 sps:$4 sm:$0xff]  }
  0x80   : > { %2491 = vmatpush3.bf16.msra.mxu1 %v2724_v7  ;;  %580 = vmatprep.subr.bf16.mxu0 %v2726_v9  ;;  %v2745_v24 = vld [vmem:[#allocation12 + $0x18] ss:$12 sps:$4 sm:$0xff]   ;;  %v2748_v26 = vld [vmem:[#allocation12 + $0x8] ss:$12 sps:$4 sm:$0xff]   ;;  %v2749_v27 = vld [vmem:[#allocation12] ss:$12 sps:$4 sm:$0xff]  }
  0x81   : > { %2492 = vmatprep.subr.bf16.mxu1 %v2728_v10  ;;  %v2746_v25 = vld [vmem:[#allocation12 + $0x4] ss:$12 sps:$4 sm:$0xff]   ;;  %v2754_v28 = vld [vmem:[#allocation14 + $0xac] ss:$12 sps:$4 sm:$0xff]   ;;  %v2752_v31 = vld [vmem:[#allocation14 + $0xa8] ss:$12 sps:$4 sm:$0xff]  }
  0x82   : > { %v2755_v29 = vld [vmem:[#allocation14 + $0xb0] ss:$12 sps:$4 sm:$0xff]   ;;  %v3472_v30 = vld [vmem:[%s3448_s20 + $0x8] sm:$0xff]   ;;  %v2758_v32 = vld [vmem:[#allocation14 + $0x94] ss:$12 sps:$4 sm:$0xff]   ;;  %v1270_v63 = vshrl.u32 %v1269_v62, 7 }
  0x83   : > { %581 = vmatpush1.bf16.msra.mxu0 %v2729_v11  ;;  %v3475_v33 = vld [vmem:[%s3448_s20 + $0x10] sm:$0xff]   ;;  %v2764_v34 = vld [vmem:[#allocation14 + $0x98] ss:$12 sps:$4 sm:$0xff]   ;;  %v2763_v36 = vld [vmem:[#allocation14 + $0x7c] ss:$12 sps:$4 sm:$0xff]   ;;  %s2439_s30 = sshll.u32 %s3219_s24, 4 }
  0x84   : > { %2493 = vmatpush3.bf16.msra.mxu1 %v2728_v10  ;;  %582 = vmatprep.subr.bf16.mxu0 %v2730_v12  ;;  %v2756_v35 = vld [vmem:[#allocation14 + $0x90] ss:$12 sps:$4 sm:$0xff]   ;;  %v2773_v37 = vld [vmem:[#allocation14 + $0x80] ss:$12 sps:$4 sm:$0xff]   ;;  %v2761_v39 = vld [vmem:[#allocation14 + $0x78] ss:$12 sps:$4 sm:$0xff]  }
  0x85   : > { %2494 = vmatprep.subr.bf16.mxu1 %v2732_v13  ;;  %v3482_v38 = vld [vmem:[%s3448_s20 + $0x18] sm:$0xff]   ;;  %v2767_v40 = vld [vmem:[#allocation14 + $0x64] ss:$12 sps:$4 sm:$0xff]   ;;  %v2782_v42 = vld [vmem:[#allocation14 + $0x68] ss:$12 sps:$4 sm:$0xff]   ;;  %v1271_v3 = vsub.s32 0, %v1270_v63 }
  0x86   : > { %v3485_v41 = vld [vmem:[%s3448_s20 + $0x20] sm:$0xff]   ;;  %v3492_v44 = vld [vmem:[%s3448_s20 + $0x28] sm:$0xff]   ;;  %v3495_v48 = vld [vmem:[%s3448_s20 + $0x30] sm:$0xff]   ;;  %s2434_s1 = sshll.u32 %s3223_s25, 5  ;;  %s2205_s17 = sshll.u32 %s3463_s21, 4  ;;  %s4107_s17 = int_to_ptr.vmem [resolvable:$true] %s2205_s17 }
  0x87   : > { %583 = vmatpush1.bf16.msra.mxu0 %v2733_v14  ;;  %v2765_v43 = vld [vmem:[#allocation14 + $0x60] ss:$12 sps:$4 sm:$0xff]   ;;  %v2770_v46 = vld [vmem:[#allocation14 + $0x48] ss:$12 sps:$4 sm:$0xff]   ;;  %v2786_v49 = vld [vmem:[#allocation14 + $0x50] ss:$12 sps:$4 sm:$0xff]   ;;  %s2202_s16 = sadd.s32 %s2439_s30, %s2434_s1 }
  0x88   : > { %2495 = vmatpush3.bf16.msra.mxu1 %v2732_v13  ;;  %584 = vmatprep.subr.bf16.mxu0 %v2734_v15  ;;  %v2772_v45 = vld [vmem:[#allocation14 + $0x4c] ss:$12 sps:$4 sm:$0xff]   ;;  %v2776_v47 = vld [vmem:[#allocation14 + $0x34] ss:$12 sps:$4 sm:$0xff]   ;;  %v2774_v50 = vld [vmem:[#allocation14 + $0x30] ss:$12 sps:$4 sm:$0xff]  }
  0x89   : > { %2496 = vmatprep.subr.bf16.mxu1 %v2736_v16  ;;  %v2787_v51 = vld [vmem:[#allocation14 + $0x38] ss:$12 sps:$4 sm:$0xff]   ;;  %v2781_v52 = vld [vmem:[#allocation14 + $0x1c] ss:$12 sps:$4 sm:$0xff]   ;;  %v2788_v56 = vld [vmem:[#allocation14 + $0x20] ss:$12 sps:$4 sm:$0xff]  }
  0x8a   : > { %v2778_v53 = vld [vmem:[%s3448_s20 + $0x38] sm:$0xff]   ;;  %v2785_v55 = vld [vmem:[#allocation14 + $0x4] ss:$12 sps:$4 sm:$0xff]   ;;  %v2783_v57 = vld [vmem:[#allocation14] ss:$12 sps:$4 sm:$0xff]   ;;  %s2435_s12 = sshll.u32 %s2202_s16, 7 }
  0x8b   : > { %585 = vmatpush1.bf16.msra.mxu0 %v2737_v17  ;;  %v2779_v54 = vld [vmem:[#allocation14 + $0x18] ss:$12 sps:$4 sm:$0xff]   ;;  %v2789_v58 = vld [vmem:[#allocation14 + $0x8] ss:$12 sps:$4 sm:$0xff]   ;;  %v1264_v59 = vld [vmem:[%s4166_s4] sm:$0x1] }
  0x8c   : > { %2497 = vmatpush3.bf16.msra.mxu1 %v2736_v16  ;;  %586 = vmatprep.subr.bf16.mxu0 %v2738_v18  ;;  %v1265_v60 = vmul.f32 1.442695, %v1264_v59  ;;  %v2790_v61 = vld [vmem:[#allocation15 + $0x38] sm:$0xff]   ;;  %v2791_v1 = vld [vmem:[#allocation15 + $0x30] sm:$0xff]   ;;  %v1285_v5 = vld [vmem:[#allocation7 + $0x8] sm:$0xff]  ;;  %s4239_s24 = sld [smem:[#allocation46_spill]] }
  0x8d   : > { %2498 = vmatprep.subr.bf16.mxu1 %v2740_v19  ;;  %v1156_v6 = vld [vmem:[#allocation8] sm:$0xff]  ;;  %v3541_v9 = vld [vmem:[%s4167_s5] ss:$0 sm:$0xff]  ;;  %v1159_v18 = vld [vmem:[#allocation8 + $0x28] sm:$0xff]  ;;  %s2189_s25 = scalar_lea.sflag [#allocation11], %s3444_s10  ;;  %s3131_s20 = scalar_lea.vmem %s4107_s17, 2048 }
  0x8e   : > { %2798 = vpow2.f32 %v1265_v60  ;;  %v1158_v12 = vld [vmem:[#allocation8 + $0x10] sm:$0xff]  ;;  %v1157_v63 = vld [vmem:[#allocation8 + $0x8] sm:$0xff]  ;;  %p3132_p2 = scmp.ne.s32.totalorder %s4107_s17, %s3131_s20  ;;  %s3248_s2 = smov [#allocation17]  }
  0x8f   : > { %587 = vmatpush1.bf16.msra.mxu0 %v2741_v21  ;;  %v1286_v13 = vld [vmem:[#allocation7] sm:$0xff]  ;;  %s3135_s7 = sshll.u32 %s3248_s2, 4  ;;  %s3136_s7 = int_to_ptr.vmem [resolvable:$false] %s3135_s7 }
  0x90   : > { %2499 = vmatpush3.bf16.msra.mxu1 %v2740_v19  ;;  %588 = vmatprep.subr.bf16.mxu0 %v2742_v22  ;;  %p3133_p7 = pnand %p3132_p2, %p3404_p3  ;;  %s3137_s9 = scalar_lea.vmem %s3136_s7, 4096 }
  0x91   : > { %2500 = vmatprep.subr.bf16.mxu1 %v2744_v23  ;;  %p3138_p9 = scmp.lt.s32.totalorder %s4107_s17, %s3136_s7  ;;  %p3139_p12 = scmp.lt.s32.totalorder %s3137_s9, %s3131_s20 }
  0x92   : > { %s4240_s18 = smov %s4239_s24  ;;  %s4105_s13 = scalar_lea.hbm %s4239_s24, %s2435_s12 }
  0x93   : > { %589 = vmatpush1.bf16.msra.mxu0 %v2745_v24  ;;  %p3134_p6 = pneg %p3133_p7  ;;  %p3140_p1 = por %p3139_p12, %p3138_p9 }
  0x94   : > { %2501 = vmatpush3.bf16.msra.mxu1 %v2744_v23  ;;  %590 = vmatprep.subr.bf16.mxu0 %v2746_v25 }
  0x95   : > { %2502 = vmatprep.subr.bf16.mxu1 %v2748_v26  ;;  %p3141_p4 = pnand %p3140_p1, %p3134_p6 }
  0x97   : > { %591 = vmatpush1.bf16.msra.mxu0 %v2749_v27 }
  0x98   : > { %2503 = vmatpush3.bf16.msra.mxu1 %v2748_v26  ;;  %2520 = vmatprep.subr.bf16.mxu0 %v2755_v29 }
  0x99   : > { %946 = vmatprep.subr.bf16.mxu1 %v2754_v28 }
  0x9a   : > { %609 = vmatmul.mubr.bf16.vlgmr.msra.gmra.mxu0 %v3468_v20 }
  0x9b   : > { %2505 = vmatmul.mubr.bf16.vlgmr.msra.gmra.mxu1 %v3472_v30  ;;  %2521 = vmatpush3.bf16.msra.mxu0 %v2755_v29  ;;  %v2799_v0 = vpop.eup %2798  ;;  %v1161_v29 = vld [vmem:[#allocation8 + $0x18] sm:$0xff] }
  0x9c   : > { %947 = vmatpush1.bf16.msra.mxu1 %v2752_v31  ;;  %618 = vmatprep.mubr.bf16.mxu0 %v3247_v4  ;;  %v1267_v2 = vsub.f32 0.0, %v2799_v0  ;;  %v1281_v0 = vld [vmem:[#allocation5] sm:$0xff] }
  0x9d   : > { %948 = vmatprep.subr.bf16.mxu1 %v2758_v32  ;;  %2508 = vmatprep.mubr.bf16.mxu1 %v3475_v33 }
  0x9e   : > { %2522 = vmatprep.subr.bf16.mxu0 %v2764_v34 }
  0x9f   : > { %2523 = vmatpush3.bf16.msra.mxu0 %v2764_v34 }
  0xa0   : > { %949 = vmatpush1.bf16.msra.mxu1 %v2756_v35  ;;  %2524 = vmatprep.subr.bf16.mxu0 %v2773_v37 }
  0xa1   : > { %950 = vmatprep.subr.bf16.mxu1 %v2763_v36 }
  0xa2   : > { %619 = vmatmul.mubr.bf16.gmra.mxu0 %v3472_v30 }
  0xa3   : > { %2509 = vmatmul.mubr.bf16.gmra.mxu1 %v3482_v38  ;;  %628 = vmatprep.mubr.bf16.mxu0 %v3247_v4 }
  0xa4   : > { %951 = vmatpush1.bf16.msra.mxu1 %v2761_v39  ;;  %2512 = vmatprep.mubr.bf16.mxu1 %v3485_v41 }
  0xa5   : > { %952 = vmatprep.subr.bf16.mxu1 %v2767_v40  ;;  %2525 = vmatpush3.bf16.msra.mxu0 %v2773_v37 }
  0xa6   : > { %2526 = vmatprep.subr.bf16.mxu0 %v2782_v42 }
  0xa8   : > { %953 = vmatpush1.bf16.msra.mxu1 %v2765_v43 }
  0xa9   : > { %954 = vmatprep.subr.bf16.mxu1 %v2772_v45  ;;  %2527 = vmatpush3.bf16.msra.mxu0 %v2782_v42 }
  0xaa   : > { %629 = vmatmul.mubr.bf16.gmra.mxu0 %v3475_v33  ;;  %2528 = vmatprep.subr.bf16.mxu0 %v2786_v49 }
  0xab   : > { %2513 = vmatmul.mubr.bf16.gmra.mxu1 %v3492_v44  ;;  %638 = vmatprep.mubr.bf16.mxu0 %v3247_v4 }
  0xac   : > { %955 = vmatpush1.bf16.msra.mxu1 %v2770_v46  ;;  %2516 = vmatprep.mubr.bf16.mxu1 %v3495_v48 }
  0xad   : > { %956 = vmatprep.subr.bf16.mxu1 %v2776_v47  ;;  %2529 = vmatpush3.bf16.msra.mxu0 %v2786_v49 }
  0xae   : > { %2530 = vmatprep.subr.bf16.mxu0 %v2787_v51 }
  0xb0   : > { %957 = vmatpush1.bf16.msra.mxu1 %v2774_v50 }
  0xb1   : > { %958 = vmatprep.subr.bf16.mxu1 %v2781_v52  ;;  %2531 = vmatpush3.bf16.msra.mxu0 %v2787_v51 }
  0xb2   : > { %639 = vmatmul.mubr.bf16.gmra.mxu0 %v3482_v38  ;;  %2532 = vmatprep.subr.bf16.mxu0 %v2788_v56 }
  0xb3   : > { %2517 = vmatmul.mubr.bf16.gmra.mxu1 %v2778_v53  ;;  %648 = vmatprep.mubr.bf16.mxu0 %v3247_v4 }
  0xb4   : > { %959 = vmatpush1.bf16.msra.mxu1 %v2779_v54  ;;  %978 = vmatprep.mubr.bf16.mxu1 %v3247_v4 }
  0xb5   : > { %960 = vmatprep.subr.bf16.mxu1 %v2785_v55  ;;  %2533 = vmatpush3.bf16.msra.mxu0 %v2788_v56 }
  0xb6   : > { %2534 = vmatprep.subr.bf16.mxu0 %v2789_v58 }
  0xb8   : > { %961 = vmatpush1.bf16.msra.mxu1 %v2783_v57 }
  0xb9   : > { %2535 = vmatpush3.bf16.msra.mxu0 %v2789_v58  ;;  %2584 = vmatprep.subr.bf16.mxu1 %v2790_v61 }
  0xba   : > { %649 = vmatmul.mubr.bf16.gmra.mxu0 %v3485_v41  ;;  %2552 = vmatprep.subr.bf16.mxu0 %v2790_v61 }
  0xbb   : > { %979 = vmatmul.mubr.bf16.vlgmr.msra.gmra.mxu1 %v3468_v20  ;;  %658 = vmatprep.mubr.bf16.mxu0 %v3247_v4 }
  0xbc   : > { %988 = vmatprep.mubr.bf16.mxu1 %v3247_v4  ;;  %2592 = vmatpush3.bf16.msra.mxu1 %v2790_v61 }
  0xbd   : > { %2585 = vmatprep.subr.bf16.mxu1 %v2791_v1 }
  0xc0   : > { %2593 = vmatpush3.bf16.msra.mxu1 %v2791_v1 }
  0xc2   : > { %659 = vmatmul.mubr.bf16.gmra.mxu0 %v3492_v44 }
  0xc3   : > { %989 = vmatmul.mubr.bf16.gmra.mxu1 %v3472_v30  ;;  %668 = vmatprep.mubr.bf16.mxu0 %v3247_v4 }
  0xc4   : > { %998 = vmatprep.mubr.bf16.mxu1 %v3247_v4 }
  0xca   : > { %669 = vmatmul.mubr.bf16.gmra.mxu0 %v3495_v48 }
  0xcb   : > { %999 = vmatmul.mubr.bf16.gmra.mxu1 %v3475_v33  ;;  %678 = vmatprep.mubr.bf16.mxu0 %v3247_v4 }
  0xcc   : > { %1008 = vmatprep.mubr.bf16.mxu1 %v3247_v4 }
  0xd2   : > { %679 = vmatmul.mubr.bf16.gmra.mxu0 %v2778_v53 }
  0xd3   : > { %1009 = vmatmul.mubr.bf16.gmra.mxu1 %v3482_v38  ;;  %2536 = vmatprep.mubr.bf16.mxu0 %v3468_v20 }
  0xd4   : > { %1018 = vmatprep.mubr.bf16.mxu1 %v3247_v4 }
  0xda   : > { %2537 = vmatmul.mubr.bf16.vlgmr.msra.gmra.mxu0 %v3472_v30  ;;  %v2792_v30 = vld [vmem:[#allocation15 + $0x28] sm:$0xff]  }
  0xdb   : > { %1019 = vmatmul.mubr.bf16.gmra.mxu1 %v3485_v41  ;;  %2540 = vmatprep.mubr.bf16.mxu0 %v3475_v33 }
  0xdc   : > { %1028 = vmatprep.mubr.bf16.mxu1 %v3247_v4  ;;  %2553 = vmatpush3.bf16.msra.mxu0 %v2790_v61 }
  0xdd   : > { %2554 = vmatprep.subr.bf16.mxu0 %v2791_v1  ;;  %2586 = vmatprep.subr.bf16.mxu1 %v2792_v30 }
  0xde   : > { %2594 = vmatpush3.bf16.msra.mxu1 %v2792_v30 }
  0xe0   : > { %2555 = vmatpush3.bf16.msra.mxu0 %v2791_v1 }
  0xe1   : > { %2556 = vmatprep.subr.bf16.mxu0 %v2792_v30 }
  0xe2   : > { %2541 = vmatmul.mubr.bf16.gmra.mxu0 %v3482_v38 }
  0xe3   : > { %1029 = vmatmul.mubr.bf16.gmra.mxu1 %v3492_v44  ;;  %2544 = vmatprep.mubr.bf16.mxu0 %v3485_v41 }
  0xe4   : > { %1038 = vmatprep.mubr.bf16.mxu1 %v3247_v4  ;;  %2557 = vmatpush3.bf16.msra.mxu0 %v2792_v30 }
  0xea   : > { %2545 = vmatmul.mubr.bf16.gmra.mxu0 %v3492_v44 }
  0xeb   : > { %1039 = vmatmul.mubr.bf16.gmra.mxu1 %v3495_v48  ;;  %2548 = vmatprep.mubr.bf16.mxu0 %v3495_v48 }
  0xec   : > { %1048 = vmatprep.mubr.bf16.mxu1 %v3247_v4  ;;  %v3535_v4 = vrot.slane %v1267_v2, %v1271_v3 }
  0xee   : > { %v1324_v7 = vadd.f32 %v1285_v5, %v3535_v4  ;;  %v1325_v21 = vadd.f32 %v1286_v13, %v3535_v4 }
  0xf2   : > { %2549 = vmatmul.mubr.bf16.gmra.mxu0 %v2778_v53 }
  0xf3   : > { %1049 = vmatmul.mubr.bf16.gmra.mxu1 %v2778_v53 }
 0x15a   : > { %v610_v8 = vpop.f32.mrf.mxu0 }
 0x15b   : > { %v3543_v10 = vpop.f32.mrf.mxu1  ;;  %v1162_v11 = vadd.f32 %v1156_v6, %v610_v8 }
 0x15c   : > { %v3545_v14 = vpop.f32.mrf.mxu0 }
 0x15d   : > { %v723_v15 = vpop.f32.mrf.mxu1  ;;  %v1294_v16 = vadd.f32 %v3541_v9, %v1162_v11  ;;  %v3548_v17 = vmax.f32 %v1324_v7, %v1162_v11 }
 0x15e   : > { %v1164_v19 = vadd.f32 %v1158_v12, %v723_v15  ;;  %v614_v20 = vpop.f32.mrf.mxu0  ;;  %v2793_v12 = vld [vmem:[#allocation15 + $0x20] sm:$0xff]   ;;  %v1283_v15 = vld [vmem:[#allocation6 + $0x8] sm:$0xff] }
 0x15f   : > { %v3551_v22 = vpop.f32.mrf.mxu1  ;;  %v1296_v23 = vmax.f32 %v1285_v5, %v1294_v16  ;;  %v1328_v24 = vsub.f32 %v1324_v7, %v3548_v17  ;;  %v1334_v25 = vsub.f32 %v1162_v11, %v3548_v17  ;;  %v1165_v26 = vadd.f32 %v1159_v18, %v614_v20  ;;  %v1160_v18 = vld [vmem:[#allocation8 + $0x20] sm:$0xff]  ;;  %2587 = vmatprep.subr.bf16.mxu1 %v2793_v12 }
 0x160   : > { %v3555_v27 = vpop.f32.mrf.mxu0  ;;  %v2407_v35 = vmul.f32 -1.442695, %v1164_v19  ;;  %2558 = vmatprep.subr.bf16.mxu0 %v2793_v12  ;;  %2595 = vmatpush3.bf16.msra.mxu1 %v2793_v12 }
 0x161   : > { %v726_v28 = vpop.f32.mrf.mxu1  ;;  %v1298_v31 = vsub.f32 %v1285_v5, %v1296_v23  ;;  %v1304_v32 = vsub.f32 %v1294_v16, %v1296_v23  ;;  %v1330_v33 = vmul.f32 1.442695, %v1328_v24  ;;  %v1336_v34 = vmul.f32 1.442695, %v1334_v25  ;;  %2559 = vmatpush3.bf16.msra.mxu0 %v2793_v12 }
 0x162   : > { %v1295_v36 = vadd.f32 %v3541_v9, %v1165_v26  ;;  %v3558_v37 = vmax.f32 %v1325_v21, %v1165_v26  ;;  %v3560_v38 = vpop.f32.mrf.mxu0  ;;  %v1167_v42 = vadd.f32 %v1161_v29, %v726_v28  ;;  %v1163_v5 = vadd.f32 %v1157_v63, %v3545_v14  ;;  %v1282_v14 = vld [vmem:[#allocation5 + $0x8] sm:$0xff] }
 0x163   : > { %v3562_v39 = vpop.f32.mrf.mxu1  ;;  %v1300_v40 = vmul.f32 1.442695, %v1298_v31  ;;  %v1306_v41 = vmul.f32 1.442695, %v1304_v32  ;;  %2800 = vpow2.f32 %v1330_v33  ;;  %v1166_v31 = vadd.f32 %v1160_v18, %v3555_v27  ;;  %v2794_v32 = vld [vmem:[#allocation15 + $0x18] sm:$0xff]  }
 0x164   : > { %2802 = vpow2.f32 %v1336_v34  ;;  %v1297_v43 = vmax.f32 %v1286_v13, %v1295_v36  ;;  %v1329_v44 = vsub.f32 %v1325_v21, %v3558_v37  ;;  %v1335_v45 = vsub.f32 %v1165_v26, %v3558_v37  ;;  %v3566_v46 = vpop.f32.mrf.mxu0  ;;  %2560 = vmatprep.subr.bf16.mxu0 %v2794_v32  ;;  %2588 = vmatprep.subr.bf16.mxu1 %v2794_v32 }
 0x165   : > { %v3568_v47 = vpop.f32.mrf.mxu1  ;;  %2804 = vpow2.f32 %v1300_v40  ;;  %v2408_v54 = vmul.f32 -1.442695, %v1167_v42  ;;  %2561 = vmatpush3.bf16.msra.mxu0 %v2794_v32  ;;  %2596 = vmatpush3.bf16.msra.mxu1 %v2794_v32 }
 0x166   : > { %2806 = vpow2.f32 %v2407_v35  ;;  %v1299_v48 = vsub.f32 %v1286_v13, %v1297_v43  ;;  %v1305_v49 = vsub.f32 %v1295_v36, %v1297_v43  ;;  %v1332_v50 = vmul.f32 1.442695, %v1329_v44  ;;  %v3570_v51 = vpop.f32.mrf.mxu0 }
 0x167   : > { %v3572_v52 = vpop.f32.mrf.mxu1  ;;  %2808 = vpow2.f32 %v1306_v41  ;;  %v1338_v53 = vmul.f32 1.442695, %v1335_v45  ;;  %v1284_v41 = vld [vmem:[#allocation6] sm:$0xff] }
 0x168   : > { %v1302_v55 = vmul.f32 1.442695, %v1299_v48  ;;  %v1308_v56 = vmul.f32 1.442695, %v1305_v49  ;;  %2810 = vpow2.f32 %v1332_v50  ;;  %v3574_v57 = vpop.f32.mrf.mxu0  ;;  %v2795_v50 = vld [vmem:[#allocation15 + $0x10] sm:$0xff]  }
 0x169   : > { %v3576_v58 = vpop.f32.mrf.mxu1  ;;  %2812 = vpow2.f32 %v1338_v53  ;;  %2562 = vmatprep.subr.bf16.mxu0 %v2795_v50  ;;  %2589 = vmatprep.subr.bf16.mxu1 %v2795_v50 }
 0x16a   : > { %2814 = vpow2.f32 %v1302_v55  ;;  %v3578_v59 = vpop.f32.mrf.mxu0  ;;  %2563 = vmatpush3.bf16.msra.mxu0 %v2795_v50  ;;  %2597 = vmatpush3.bf16.msra.mxu1 %v2795_v50 }
 0x16b   : > { %v3580_v60 = vpop.f32.mrf.mxu1  ;;  %2816 = vpow2.f32 %v2408_v54  ;;  %v1389_v54 = vadd.f32 %v3548_v17, %v3535_v4 }
 0x16c   : > { %4205 = vst [vmem:[#allocation26_spill] sm:$0xff] %v3580_v60  ;;  %2818 = vpow2.f32 %v1308_v56  ;;  %v3582_v61 = vpop.f32.mrf.mxu0 }
 0x16d   : > { %v3584_v62 = vpop.f32.mrf.mxu1 }
 0x16e   : > { %v3586_v1 = vpop.f32.mrf.mxu0 }
 0x16f   : > { %v3588_v2 = vpop.f32.mrf.mxu1 }
 0x170   : > { %4206 = vst [vmem:[#allocation27_spill] sm:$0xff] %v3588_v2  ;;  %v2801_v3 = vpop.eup %2800  ;;  %v3591_v6 = vpop.f32.mrf.mxu0 }
 0x171   : > { %v3593_v7 = vpop.f32.mrf.mxu1  ;;  %v3595_v8 = vpop.eup %2802  ;;  %v1340_v11 = vmul.f32 %v2801_v3, %v1281_v0  ;;  %v1346_v53 = vmul.f32 %v2801_v3, %v1283_v15 }
 0x172   : > { %v2805_v13 = vpop.eup %2804  ;;  %v1342_v16 = vmul.f32 %v3595_v8, %v1163_v5  ;;  %v3598_v19 = vpop.f32.mrf.mxu0 }
 0x173   : > { %v3600_v20 = vpop.f32.mrf.mxu1  ;;  %v2807_v21 = vpop.eup %2806  ;;  %v1318_v23 = vmul.f32 %v2805_v13, %v1283_v15  ;;  %v1310_v12 = vmul.f32 %v2805_v13, %v1281_v0  ;;  %v2796_v0 = vld [vmem:[#allocation15 + $0x8] sm:$0xff]  }
 0x174   : > { %4207 = vst [vmem:[#allocation28_spill] sm:$0xff] %v3600_v20  ;;  %v2809_v24 = vpop.eup %2808  ;;  %v3602_v25 = vadd.f32 %v1342_v16, %v1340_v11  ;;  %v3604_v26 = vpop.f32.mrf.mxu0  ;;  %v1875_v55 = vadd.f32 1.0, %v2807_v21  ;;  %2564 = vmatprep.subr.bf16.mxu0 %v2796_v0  ;;  %2590 = vmatprep.subr.bf16.mxu1 %v2796_v0 }
 0x175   : > { %v3606_v28 = vpop.f32.mrf.mxu1  ;;  %v2811_v29 = vpop.eup %2810  ;;  %v1320_v30 = vadd.f32 %v2809_v24, %v1318_v23  ;;  %v1312_v16 = vmul.f32 %v2809_v24, %v1163_v5  ;;  %v3630_v5 = vadd.f32 %v3595_v8, %v1346_v53  ;;  %2565 = vmatpush3.bf16.msra.mxu0 %v2796_v0  ;;  %2598 = vmatpush3.bf16.msra.mxu1 %v2796_v0 }
 0x176   : > { %4208 = vst [vmem:[#allocation29_spill] sm:$0xff] %v3606_v28  ;;  %v2813_v33 = vpop.eup %2812  ;;  %v1341_v34 = vmul.f32 %v2811_v29, %v1282_v14  ;;  %v3609_v35 = vpop.f32.mrf.mxu0 }
 0x177   : > { %v3611_v36 = vpop.f32.mrf.mxu1  ;;  %v2815_v40 = vpop.eup %2814  ;;  %v1343_v42 = vmul.f32 %v2813_v33, %v1166_v31  ;;  %2820 = vrcp.f32 %v1320_v30  ;;  %v1347_v30 = vmul.f32 %v2811_v29, %v1284_v41 }
 0x178   : > { %4209 = vst [vmem:[#allocation30_spill] sm:$0xff] %v3611_v36  ;;  %v2817_v43 = vpop.eup %2816  ;;  %v1319_v44 = vmul.f32 %v2815_v40, %v1284_v41  ;;  %v3613_v45 = vpop.f32.mrf.mxu0  ;;  %v1311_v32 = vmul.f32 %v2815_v40, %v1282_v14  ;;  %v1314_v41 = vadd.f32 %v1312_v16, %v1310_v12 }
 0x179   : > { %v3615_v48 = vpop.f32.mrf.mxu1  ;;  %v2819_v27 = vpop.eup %2818  ;;  %v3617_v49 = vadd.f32 %v1343_v42, %v1341_v34  ;;  %v1876_v18 = vadd.f32 1.0, %v2817_v43  ;;  %v3640_v43 = vadd.f32 %v2813_v33, %v1347_v30 }
 0x17a   : > { %4210 = vst [vmem:[#allocation31_spill] sm:$0xff] %v3615_v48  ;;  %v1321_v56 = vadd.f32 %v2819_v27, %v1319_v44  ;;  %v3621_v63 = vpop.f32.mrf.mxu0  ;;  %v1313_v34 = vmul.f32 %v2819_v27, %v1166_v31 }
 0x17b   : > { %v980_v11 = vpop.f32.mrf.mxu1 }
 0x17c   : > { %v1174_v23 = vadd.f32 %v980_v11, %v3560_v38  ;;  %2822 = vrcp.f32 %v1321_v56  ;;  %v3624_v3 = vpop.f32.mrf.mxu0  ;;  %v1390_v38 = vadd.f32 %v3558_v37, %v3535_v4  ;;  %v3642_v8 = vadd.f32 %v1313_v34, %v1311_v32  ;;  %v2797_v56 = vld [vmem:[#allocation15] sm:$0xff]  }
 0x17d   : > { %v982_v15 = vpop.f32.mrf.mxu1  ;;  %2824 = vrcp.f32 %v1875_v55  ;;  %2566 = vmatprep.subr.bf16.mxu0 %v2797_v56  ;;  %2591 = vmatprep.subr.bf16.mxu1 %v2797_v56 }
 0x17e   : > { %v1357_v21 = vadd.f32 %v3541_v9, %v1174_v23  ;;  %v3627_v42 = vmax.f32 %v1389_v54, %v1174_v23  ;;  %v3634_v13 = vpop.f32.mrf.mxu0  ;;  %2826 = vrcp.f32 %v1876_v18  ;;  %2567 = vmatpush3.bf16.msra.mxu0 %v2797_v56  ;;  %2599 = vmatpush3.bf16.msra.mxu1 %v2797_v56 }
 0x17f   : > { %v984_v14 = vpop.f32.mrf.mxu1 }
 0x180   : > { %v1359_v24 = vmax.f32 %v3548_v17, %v1357_v21  ;;  %v1393_v29 = vsub.f32 %v1389_v54, %v3627_v42  ;;  %v1399_v31 = vsub.f32 %v1174_v23, %v3627_v42  ;;  %v1177_v40 = vadd.f32 %v984_v14, %v3570_v51  ;;  %v3644_v44 = vpop.f32.mrf.mxu0 }
 0x181   : > { %v986_v27 = vpop.f32.mrf.mxu1  ;;  %v3648_v51 = vadd.f32 %v982_v15, %v3566_v46  ;;  %v1454_v18 = vadd.f32 %v3627_v42, %v3535_v4 }
 0x182   : > { %v1361_v50 = vsub.f32 %v3548_v17, %v1359_v24  ;;  %v1367_v53 = vsub.f32 %v1357_v21, %v1359_v24  ;;  %v1395_v54 = vmul.f32 1.442695, %v1393_v29  ;;  %v1401_v55 = vmul.f32 1.442695, %v1399_v31  ;;  %v3653_v12 = vpop.f32.mrf.mxu0 }
 0x183   : > { %v1358_v33 = vadd.f32 %v3541_v9, %v1177_v40  ;;  %v3651_v11 = vmax.f32 %v1390_v38, %v1177_v40  ;;  %v990_v16 = vpop.f32.mrf.mxu1  ;;  %v3664_v14 = vadd.f32 %v986_v27, %v3574_v57 }
 0x184   : > { %v1363_v23 = vmul.f32 1.442695, %v1361_v50  ;;  %v1369_v17 = vmul.f32 1.442695, %v1367_v53  ;;  %2828 = vpow2.f32 %v1395_v54  ;;  %v1180_v30 = vadd.f32 %v990_v16, %v3578_v59  ;;  %v3661_v15 = vpop.f32.mrf.mxu0  ;;  %v2821_v0 = vpop.eup %2820 }
 0x185   : > { %2830 = vpow2.f32 %v1401_v55  ;;  %v1360_v46 = vmax.f32 %v3558_v37, %v1358_v33  ;;  %v1394_v32 = vsub.f32 %v1390_v38, %v3651_v11  ;;  %v1400_v34 = vsub.f32 %v1177_v40, %v3651_v11  ;;  %v992_v21 = vpop.f32.mrf.mxu1 }
 0x186   : > { %2832 = vpow2.f32 %v1363_v23  ;;  %v1422_v59 = vadd.f32 %v3541_v9, %v1180_v30  ;;  %v3667_v24 = vmax.f32 %v1454_v18, %v1180_v30  ;;  %v3670_v40 = vpop.f32.mrf.mxu0  ;;  %v3675_v27 = vmul.f32 %v2821_v0, %v1314_v41 }
 0x187   : > { %2834 = vpow2.f32 %v1369_v17  ;;  %v1362_v29 = vsub.f32 %v3558_v37, %v1360_v46  ;;  %v1368_v38 = vsub.f32 %v1358_v33, %v1360_v46  ;;  %v1397_v31 = vmul.f32 1.442695, %v1394_v32  ;;  %v994_v50 = vpop.f32.mrf.mxu1 }
 0x188   : > { %v1403_v53 = vmul.f32 1.442695, %v1400_v34  ;;  %v1424_v54 = vmax.f32 %v3627_v42, %v1422_v59  ;;  %v1458_v55 = vsub.f32 %v1454_v18, %v3667_v24  ;;  %v1464_v57 = vsub.f32 %v1180_v30, %v3667_v24  ;;  %v3677_v56 = vpop.f32.mrf.mxu0 }
 0x189   : > { %v1365_v16 = vmul.f32 1.442695, %v1362_v29  ;;  %v1371_v23 = vmul.f32 1.442695, %v1368_v38  ;;  %2836 = vpow2.f32 %v1397_v31  ;;  %v996_v37 = vpop.f32.mrf.mxu1  ;;  %v2823_v33 = vpop.eup %2822  ;;  %v3681_v18 = vadd.f32 %v992_v21, %v3582_v61 }
 0x18a   : > { %2838 = vpow2.f32 %v1403_v53  ;;  %v1426_v17 = vsub.f32 %v3627_v42, %v1424_v54  ;;  %v1432_v46 = vsub.f32 %v1422_v59, %v1424_v54  ;;  %v1460_v32 = vmul.f32 1.442695, %v1458_v55  ;;  %v3684_v30 = vpop.f32.mrf.mxu0  ;;  %v3686_v29 = vpop.eup %2824 }
 0x18b   : > { %2840 = vpow2.f32 %v1365_v16  ;;  %v1466_v34 = vmul.f32 1.442695, %v1464_v57  ;;  %v1183_v41 = vadd.f32 %v994_v50, %v3586_v1  ;;  %v1000_v0 = vpop.f32.mrf.mxu1  ;;  %v1455_v42 = vadd.f32 %v3651_v11, %v3535_v4  ;;  %v3699_v53 = vpop.eup %2826 }
 0x18c   : > { %2842 = vpow2.f32 %v1371_v23  ;;  %v1428_v38 = vmul.f32 1.442695, %v1426_v17  ;;  %v1434_v31 = vmul.f32 1.442695, %v1432_v46  ;;  %v3691_v59 = vmul.f32 %v2823_v33, %v3642_v8  ;;  %v3697_v1 = vpop.f32.mrf.mxu0 }
 0x18d   : > { %2844 = vpow2.f32 %v1460_v32  ;;  %v1423_v61 = vadd.f32 %v3541_v9, %v1183_v41  ;;  %v3695_v21 = vadd.f32 %v1000_v0, %v3598_v19  ;;  %4211 = vst [vmem:[#allocation32_spill] sm:$0xff] %v3697_v1  ;;  %v1002_v50 = vpop.f32.mrf.mxu1  ;;  %v3701_v54 = vmax.f32 %v1455_v42, %v1183_v41 }
 0x18e   : > { %2846 = vpow2.f32 %v1428_v38  ;;  %v3704_v55 = vadd.f32 %v996_v37, %v3591_v6  ;;  %v1519_v8 = vadd.f32 %v3667_v24, %v3535_v4  ;;  %v3712_v16 = vadd.f32 %v1002_v50, %v3604_v26  ;;  %v3714_v23 = vpop.f32.mrf.mxu0 }
 0x18f   : > { %2848 = vpow2.f32 %v1434_v31  ;;  %v1425_v57 = vmax.f32 %v3651_v11, %v1423_v61  ;;  %v1487_v19 = vadd.f32 %v3541_v9, %v3695_v21  ;;  %v1004_v33 = vpop.f32.mrf.mxu1  ;;  %v1459_v17 = vsub.f32 %v1455_v42, %v3701_v54 }
 0x190   : > { %2850 = vpow2.f32 %v1466_v34  ;;  %v1465_v6 = vsub.f32 %v1183_v41, %v3701_v54  ;;  %v3719_v37 = vmax.f32 %v1519_v8, %v3695_v21  ;;  %v3724_v26 = vadd.f32 %v1004_v33, %v3609_v35  ;;  %v3726_v31 = vpop.f32.mrf.mxu0 }
 0x191   : > { %v2829_v46 = vpop.eup %2828  ;;  %v1427_v32 = vsub.f32 %v3651_v11, %v1425_v57  ;;  %v1433_v0 = vsub.f32 %v1423_v61, %v1425_v57  ;;  %v1489_v38 = vmax.f32 %v3667_v24, %v1487_v19  ;;  %4212 = vst [vmem:[#allocation33_spill] sm:$0xff] %v3726_v31  ;;  %v1462_v41 = vmul.f32 1.442695, %v1459_v17 }
 0x192   : > { %v2831_v50 = vpop.eup %2830  ;;  %v1411_v34 = vmul.f32 %v2829_v46, %v3630_v5  ;;  %v1405_v42 = vmul.f32 %v2829_v46, %v3602_v25  ;;  %v1468_v36 = vmul.f32 1.442695, %v1465_v6  ;;  %v3732_v57 = vpop.f32.mrf.mxu0  ;;  %v1523_v1 = vsub.f32 %v1519_v8, %v3719_v37 }
 0x193   : > { %v2833_v20 = vpop.eup %2832  ;;  %v1407_v2 = vmul.f32 %v2831_v50, %v3648_v51  ;;  %v1430_v48 = vmul.f32 1.442695, %v1427_v32  ;;  %v1436_v11 = vmul.f32 1.442695, %v1433_v0  ;;  %v1491_v61 = vsub.f32 %v3667_v24, %v1489_v38  ;;  %4213 = vst [vmem:[#allocation34_spill] sm:$0xff] %v3732_v57  ;;  %v3740_v57 = vpop.f32.mrf.mxu1 }
 0x194   : > { %v2835_v35 = vpop.eup %2834  ;;  %v1413_v33 = vadd.f32 %v2831_v50, %v1411_v34  ;;  %v1373_v31 = vmul.f32 %v2833_v20, %v3602_v25  ;;  %v1382_v60 = vmul.f32 %v2833_v20, %v3630_v5  ;;  %2852 = vpow2.f32 %v1462_v41  ;;  %v3737_v28 = vpop.f32.mrf.mxu0 }
 0x195   : > { %v1375_v46 = vmul.f32 %v2835_v35, %v3648_v51  ;;  %v1409_v17 = vadd.f32 %v1407_v2, %v1405_v42  ;;  %2854 = vpow2.f32 %v1430_v48  ;;  %v1493_v6 = vmul.f32 1.442695, %v1491_v61  ;;  %4214 = vst [vmem:[#allocation35_spill] sm:$0xff] %v3737_v28 }
 0x196   : > { %v2837_v32 = vpop.eup %2836  ;;  %v1384_v0 = vadd.f32 %v2835_v35, %v1382_v60  ;;  %2856 = vpow2.f32 %v1436_v11  ;;  %v1497_v24 = vsub.f32 %v1487_v19, %v1489_v38  ;;  %v3746_v2 = vpop.f32.mrf.mxu0  ;;  %v1525_v19 = vmul.f32 1.442695, %v1523_v1 }
 0x197   : > { %v2839_v50 = vpop.eup %2838  ;;  %v3742_v25 = vadd.f32 %v1375_v46, %v1373_v31  ;;  %v1412_v20 = vmul.f32 %v2837_v32, %v3640_v43  ;;  %v1406_v5 = vmul.f32 %v2837_v32, %v3617_v49  ;;  %2858 = vpow2.f32 %v1468_v36  ;;  %4215 = vst [vmem:[#allocation36_spill] sm:$0xff] %v3746_v2  ;;  %v1010_v35 = vpop.f32.mrf.mxu1 }
 0x198   : > { %v2841_v48 = vpop.eup %2840  ;;  %2860 = vrcp.f32 %v1384_v0  ;;  %v1408_v60 = vmul.f32 %v2839_v50, %v3664_v14  ;;  %v1499_v51 = vmul.f32 1.442695, %v1497_v24  ;;  %v3751_v42 = vpop.f32.mrf.mxu0  ;;  %v1529_v61 = vsub.f32 %v3695_v21, %v3719_v37 }
 0x199   : > { %v2843_v38 = vpop.eup %2842  ;;  %v1414_v8 = vadd.f32 %v2839_v50, %v1412_v20  ;;  %v1374_v34 = vmul.f32 %v2841_v48, %v3617_v49  ;;  %v1383_v31 = vmul.f32 %v2841_v48, %v3640_v43  ;;  %2862 = vpow2.f32 %v1493_v6  ;;  %4216 = vst [vmem:[#allocation37_spill] sm:$0xff] %v3751_v42 }
 0x19a   : > { %v2845_v41 = vpop.eup %2844  ;;  %v1376_v36 = vmul.f32 %v2843_v38, %v3664_v14  ;;  %v1410_v11 = vadd.f32 %v1408_v60, %v1406_v5  ;;  %2864 = vpow2.f32 %v1499_v51  ;;  %v3756_v49 = vpop.f32.mrf.mxu0  ;;  %v1531_v20 = vmul.f32 1.442695, %v1529_v61 }
 0x19b   : > { %v2847_v46 = vpop.eup %2846  ;;  %v1385_v1 = vadd.f32 %v2843_v38, %v1383_v31  ;;  %v1476_v32 = vmul.f32 %v2845_v41, %v1413_v33  ;;  %v1470_v0 = vmul.f32 %v2845_v41, %v1409_v17  ;;  %2866 = vpow2.f32 %v1525_v19 }
 0x19c   : > { %v2849_v43 = vpop.eup %2848  ;;  %v3758_v6 = vadd.f32 %v1376_v36, %v1374_v34  ;;  %v1438_v24 = vmul.f32 %v2847_v46, %v1409_v17  ;;  %v1447_v50 = vmul.f32 %v2847_v46, %v1413_v33  ;;  %v1488_v21 = vadd.f32 %v3541_v9, %v3724_v26  ;;  %v3765_v60 = vpop.f32.mrf.mxu0 }
 0x19d   : > { %v2851_v14 = vpop.eup %2850  ;;  %2868 = vrcp.f32 %v1385_v1  ;;  %v1440_v5 = vmul.f32 %v2849_v43, %v3681_v18  ;;  %v1520_v48 = vadd.f32 %v3701_v54, %v3535_v4  ;;  %v3768_v17 = vpop.f32.mrf.mxu1  ;;  %v1988_v41 = vmul.f32 %v3699_v53, %v3691_v59 }
 0x19e   : > { %v1478_v51 = vadd.f32 %v2851_v14, %v1476_v32  ;;  %v1449_v19 = vadd.f32 %v2849_v43, %v1447_v50  ;;  %v1472_v38 = vmul.f32 %v2851_v14, %v3681_v18  ;;  %2870 = vpow2.f32 %v1531_v20  ;;  %v3778_v36 = vpop.f32.mrf.mxu0 }
 0x19f   : > { %v3770_v33 = vadd.f32 %v1440_v5, %v1438_v24  ;;  %v1490_v34 = vmax.f32 %v3701_v54, %v1488_v21  ;;  %v3774_v31 = vmax.f32 %v1520_v48, %v3724_v26  ;;  %v1987_v18 = vmul.f32 %v3686_v29, %v3675_v27 }
 0x1a0   : > { %v1474_v61 = vadd.f32 %v1472_v38, %v1470_v0  ;;  %2872 = vrcp.f32 %v1449_v19  ;;  %v3783_v46 = vadd.f32 %v1010_v35, %v3621_v63  ;;  %v3789_v59 = vpop.f32.mrf.mxu0  ;;  %v1014_v63 = vpop.f32.mrf.mxu1 }
 0x1a1   : > { %v2853_v1 = vpop.eup %2852  ;;  %v1492_v32 = vsub.f32 %v3701_v54, %v1490_v34  ;;  %v1498_v43 = vsub.f32 %v1488_v21, %v1490_v34  ;;  %v1524_v24 = vsub.f32 %v1520_v48, %v3774_v31  ;;  %v1530_v50 = vsub.f32 %v3724_v26, %v3774_v31 }
 0x1a2   : > { %v2855_v53 = vpop.eup %2854  ;;  %v1477_v0 = vmul.f32 %v2853_v1, %v1414_v8  ;;  %v1471_v20 = vmul.f32 %v2853_v1, %v1410_v11  ;;  %v2003_v14 = vpack.c.bf16 %v1988_v41, %v1987_v18  ;;  %v1552_v27 = vadd.f32 %v3541_v9, %v3783_v46  ;;  %v3793_v19 = vpop.f32.mrf.mxu0 }
 0x1a3   : > { %v2857_v29 = vpop.eup %2856  ;;  %v1439_v35 = vmul.f32 %v2855_v53, %v1410_v11  ;;  %v1448_v5 = vmul.f32 %v2855_v53, %v1414_v8  ;;  %v1495_v54 = vmul.f32 1.442695, %v1492_v32  ;;  %v1501_v21 = vmul.f32 1.442695, %v1498_v43 }
 0x1a4   : > { %v2859_v48 = vpop.eup %2858  ;;  %v1441_v26 = vmul.f32 %v2857_v29, %v3704_v55  ;;  %v1527_v38 = vmul.f32 1.442695, %v1524_v24  ;;  %v1533_v34 = vmul.f32 1.442695, %v1530_v50  ;;  %2568 = vmatprep.mubr.bf16.mxu0 %v2003_v14  ;;  %v1554_v1 = vmax.f32 %v3719_v37, %v1552_v27  ;;  %v3800_v8 = vpop.f32.mrf.mxu0 }
 0x1a5   : > { %v2861_v41 = vpop.eup %2860  ;;  %v3797_v18 = vadd.f32 %v2859_v48, %v1477_v0  ;;  %v1450_v42 = vadd.f32 %v2857_v29, %v1448_v5  ;;  %v1473_v28 = vmul.f32 %v2859_v48, %v3704_v55  ;;  %2874 = vpow2.f32 %v1495_v54  ;;  %v1016_v50 = vpop.f32.mrf.mxu1 }
 0x1a6   : > { %v2863_v11 = vpop.eup %2862  ;;  %v3803_v32 = vmul.f32 %v2861_v41, %v3742_v25  ;;  %v3805_v43 = vadd.f32 %v1441_v26, %v1439_v35  ;;  %2876 = vpow2.f32 %v1501_v21  ;;  %v1556_v24 = vsub.f32 %v3719_v37, %v1554_v1  ;;  %v3810_v55 = vpop.f32.mrf.mxu0 }
 0x1a7   : > { %v2865_v53 = vpop.eup %2864  ;;  %v3808_v14 = vadd.f32 %v1473_v28, %v1471_v20  ;;  %2878 = vrcp.f32 %v1450_v42  ;;  %v1503_v0 = vmul.f32 %v2863_v11, %v1474_v61  ;;  %v1512_v29 = vmul.f32 %v2863_v11, %v1478_v51  ;;  %v1020_v11 = vpop.f32.mrf.mxu1 }
 0x1a8   : > { %4217 = vst [vmem:[#allocation38_spill] sm:$0xff] %v3803_v32  ;;  %v2867_v5 = vpop.eup %2866  ;;  %v1505_v54 = vmul.f32 %v2865_v53, %v3712_v16  ;;  %2880 = vpow2.f32 %v1527_v38  ;;  %v1558_v25 = vmul.f32 1.442695, %v1556_v24  ;;  %v1562_v48 = vsub.f32 %v1552_v27, %v1554_v1  ;;  %v3813_v41 = vpop.f32.mrf.mxu0 }
 0x1a9   : > { %v1541_v35 = vmul.f32 %v2867_v5, %v1478_v51  ;;  %v1514_v26 = vadd.f32 %v2865_v53, %v1512_v29  ;;  %v1535_v21 = vmul.f32 %v2867_v5, %v1474_v61  ;;  %2882 = vpow2.f32 %v1533_v34 }
 0x1aa   : > { %v2869_v32 = vpop.eup %2868  ;;  %v3815_v28 = vadd.f32 %v1505_v54, %v1503_v0  ;;  %2884 = vpow2.f32 %v1558_v25  ;;  %v1564_v42 = vmul.f32 1.442695, %v1562_v48  ;;  %v1584_v20 = vadd.f32 %v3719_v37, %v3535_v4  ;;  %v3825_v27 = vpop.f32.mrf.mxu0 }
 0x1ab   : > { %v2871_v2 = vpop.eup %2870  ;;  %v3820_v38 = vmul.f32 %v2869_v32, %v3758_v6  ;;  %2886 = vrcp.f32 %v1514_v26  ;;  %v1190_v51 = vadd.f32 %v3740_v57, %v3613_v45  ;;  %v1195_v61 = vadd.f32 %v1014_v63, %v3634_v13  ;;  %v3864_v25 = vpop.f32.mrf.mxu1 }
 0x1ac   : > { %v3827_v34 = vadd.f32 %v2871_v2, %v1541_v35  ;;  %v1537_v1 = vmul.f32 %v2871_v2, %v3712_v16  ;;  %2888 = vpow2.f32 %v1564_v42  ;;  %v1586_v37 = vmax.f32 %v1584_v20, %v3783_v46  ;;  %v3841_v57 = vpop.f32.mrf.mxu0 }
 0x1ad   : > { %4218 = vst [vmem:[#allocation39_spill] sm:$0xff] %v3820_v38  ;;  %v2873_v24 = vpop.eup %2872  ;;  %v3833_v6 = vadd.f32 %v3768_v17, %v3624_v3  ;;  %v1553_v32 = vadd.f32 %v3541_v9, %v1195_v61  ;;  %v1585_v45 = vadd.f32 %v3774_v31, %v3535_v4  ;;  %v3839_v13 = vadd.f32 %v1020_v11, %v3653_v12 }
 0x1ae   : > { %v3844_v16 = vmul.f32 %v2873_v24, %v3770_v33  ;;  %v3846_v2 = vadd.f32 %v1537_v1, %v1535_v21  ;;  %v1588_v63 = vsub.f32 %v1584_v20, %v1586_v37  ;;  %v1594_v53 = vsub.f32 %v3783_v46, %v1586_v37  ;;  %v3857_v29 = vpop.f32.mrf.mxu0 }
 0x1af   : > { %v1555_v3 = vmax.f32 %v3774_v31, %v1553_v32  ;;  %v3850_v17 = vmax.f32 %v1585_v45, %v1195_v61  ;;  %v3853_v0 = vadd.f32 %v1016_v50, %v3644_v44  ;;  %v1617_v12 = vadd.f32 %v3541_v9, %v3839_v13  ;;  %4220 = vst [vmem:[#allocation41_spill] sm:$0xff] %v3857_v29 }
 0x1b0   : > { %4219 = vst [vmem:[#allocation40_spill] sm:$0xff] %v3844_v16  ;;  %v1590_v5 = vmul.f32 1.442695, %v1588_v63  ;;  %v1596_v33 = vmul.f32 1.442695, %v1594_v53  ;;  %v3860_v54 = vadd.f32 %v1586_v37, %v3535_v4  ;;  %v1182_v46 = vadd.f32 %v3756_v49, %v3568_v47  ;;  %v3869_v26 = vpop.f32.mrf.mxu0 }
 0x1b1   : > { %v1557_v48 = vsub.f32 %v3774_v31, %v1555_v3  ;;  %v1563_v35 = vsub.f32 %v1553_v32, %v1555_v3  ;;  %v1589_v44 = vsub.f32 %v1585_v45, %v3850_v17  ;;  %v1595_v50 = vsub.f32 %v1195_v61, %v3850_v17  ;;  %4221 = vst [vmem:[#allocation42_spill] sm:$0xff] %v3869_v26  ;;  %v1024_v3 = vpop.f32.mrf.mxu1 }
 0x1b2   : > { %v2875_v21 = vpop.eup %2874  ;;  %2890 = vpow2.f32 %v1590_v5  ;;  %v1619_v42 = vmax.f32 %v1586_v37, %v1617_v12  ;;  %v3873_v20 = vmax.f32 %v3860_v54, %v3839_v13  ;;  %v2411_v11 = vmul.f32 -1.442695, %v1182_v46  ;;  %v2550_v24 = vpop.f32.mrf.mxu0 }
 0x1b3   : > { %v2877_v47 = vpop.eup %2876  ;;  %v1504_v49 = vmul.f32 %v2875_v21, %v3808_v14  ;;  %v1513_v31 = vmul.f32 %v2875_v21, %v3797_v18  ;;  %2892 = vpow2.f32 %v1596_v33  ;;  %v1560_v1 = vmul.f32 1.442695, %v1557_v48  ;;  %1260 = vst [vmem:[#allocation8 + $0x10] sm:$0xff] %v2550_v24 }
 0x1b4   : > { %v2879_v32 = vpop.eup %2878  ;;  %v1506_v61 = vmul.f32 %v2877_v47, %v1190_v51  ;;  %v1566_v45 = vmul.f32 1.442695, %v1563_v35  ;;  %v1592_v63 = vmul.f32 1.442695, %v1589_v44  ;;  %v1598_v53 = vmul.f32 1.442695, %v1595_v50  ;;  %v3880_v26 = vpop.f32.mrf.mxu0 }
 0x1b5   : > { %v2881_v5 = vpop.eup %2880  ;;  %v3878_v16 = vmul.f32 %v2879_v32, %v3805_v43  ;;  %v1515_v46 = vadd.f32 %v2877_v47, %v1513_v31  ;;  %2894 = vpow2.f32 %v1560_v1  ;;  %v1621_v38 = vsub.f32 %v1586_v37, %v1619_v42 }
 0x1b6   : > { %v2883_v21 = vpop.eup %2882  ;;  %v1542_v33 = vmul.f32 %v2881_v5, %v3797_v18  ;;  %v3883_v48 = vadd.f32 %v1506_v61, %v1504_v49  ;;  %v1536_v35 = vmul.f32 %v2881_v5, %v3808_v14  ;;  %2896 = vpow2.f32 %v1566_v45  ;;  %v2551_v43 = vpop.f32.mrf.mxu0 }
 0x1b7   : > { %v2885_v44 = vpop.eup %2884  ;;  %v1538_v50 = vmul.f32 %v2883_v21, %v1190_v51  ;;  %2898 = vrcp.f32 %v1515_v46  ;;  %v1623_v24 = vmul.f32 1.442695, %v1621_v38  ;;  %v1627_v29 = vsub.f32 %v1617_v12, %v1619_v42  ;;  %v3890_v18 = vpop.f32.mrf.mxu1  ;;  %1263 = vst [vmem:[#allocation8 + $0x18] sm:$0xff] %v2551_v43 }
 0x1b8   : > { %v2887_v32 = vpop.eup %2886  ;;  %v3886_v47 = vadd.f32 %v2883_v21, %v1542_v33  ;;  %v1568_v37 = vmul.f32 %v2885_v44, %v3846_v2  ;;  %v1577_v31 = vmul.f32 %v2885_v44, %v3827_v34  ;;  %2900 = vpow2.f32 %v1592_v63 }
 0x1b9   : > { %v2889_v49 = vpop.eup %2888  ;;  %v3893_v14 = vmul.f32 %v2887_v32, %v3815_v28  ;;  %v1540_v51 = vadd.f32 %v1538_v50, %v1536_v35  ;;  %2902 = vpow2.f32 %v1598_v53  ;;  %v1629_v38 = vmul.f32 1.442695, %v1627_v29  ;;  %v1030_v5 = vpop.f32.mrf.mxu1 }
 0x1ba   : > { %v1570_v12 = vmul.f32 %v2889_v49, %v3833_v6  ;;  %v1579_v42 = vadd.f32 %v2889_v49, %v1577_v31  ;;  %2904 = vpow2.f32 %v1623_v24  ;;  %v1653_v1 = vsub.f32 %v3860_v54, %v3873_v20 }
 0x1bb   : > { %2906 = vpow2.f32 %v1629_v38  ;;  %v1659_v61 = vsub.f32 %v3839_v13, %v3873_v20  ;;  %v1176_v45 = vadd.f32 %v3543_v10, %v3765_v60  ;;  %v1201_v28 = vadd.f32 %v1024_v3, %v3670_v40 }
 0x1bc   : > { %v3903_v63 = vadd.f32 %v1570_v12, %v1568_v37  ;;  %2908 = vrcp.f32 %v1579_v42  ;;  %v1655_v29 = vmul.f32 1.442695, %v1653_v1  ;;  %v1650_v53 = vadd.f32 %v3850_v17, %v3535_v4 }
 0x1bd   : > { %v1661_v46 = vmul.f32 1.442695, %v1659_v61  ;;  %2910 = vpow2.f32 %v2411_v11  ;;  %v2409_v54 = vmul.f32 -1.442695, %v1176_v45  ;;  %v1618_v21 = vadd.f32 %v3541_v9, %v1201_v28  ;;  %v3936_v61 = vld [vmem:[%s4167_s5] ss:$0 sm:$0xff] }
 0x1be   : > { %2912 = vpow2.f32 %v1655_v29  ;;  %v3910_v13 = vadd.f32 %v3864_v25, %v3661_v15  ;;  %v3912_v10 = vmax.f32 %v1650_v53, %v1201_v28  ;;  %v1185_v40 = vadd.f32 %v3778_v36, %v3576_v58 }
 0x1bf   : > { %v2891_v60 = vpop.eup %2890  ;;  %2914 = vpow2.f32 %v1661_v46  ;;  %v1620_v3 = vmax.f32 %v3850_v17, %v1618_v21  ;;  %v1179_v11 = vadd.f32 %v3551_v22, %v3789_v59  ;;  %v3920_v33 = vadd.f32 %v1030_v5, %v3684_v30 }
 0x1c0   : > { %v2893_v9 = vpop.eup %2892  ;;  %v1606_v35 = vmul.f32 %v2891_v60, %v3827_v34  ;;  %v1600_v15 = vmul.f32 %v2891_v60, %v3846_v2  ;;  %2916 = vpow2.f32 %v2409_v54  ;;  %v1654_v25 = vsub.f32 %v1650_v53, %v3912_v10 }
 0x1c1   : > { %v1602_v58 = vmul.f32 %v2893_v9, %v3833_v6  ;;  %v1622_v36 = vsub.f32 %v3850_v17, %v1620_v3  ;;  %v1628_v44 = vsub.f32 %v1618_v21, %v1620_v3  ;;  %v1660_v50 = vsub.f32 %v1201_v28, %v3912_v10 }
 0x1c2   : > { %v2895_v24 = vpop.eup %2894  ;;  %v1608_v22 = vadd.f32 %v2893_v9, %v1606_v35  ;;  %v1657_v59 = vmul.f32 1.442695, %v1654_v25  ;;  %v2412_v30 = vmul.f32 -1.442695, %v1185_v40  ;;  %v2410_v43 = vmul.f32 -1.442695, %v1179_v11 }
 0x1c3   : > { %v2897_v32 = vpop.eup %2896  ;;  %v1604_v37 = vadd.f32 %v1602_v58, %v1600_v15  ;;  %v1569_v34 = vmul.f32 %v2895_v24, %v1540_v51  ;;  %v1578_v2 = vmul.f32 %v2895_v24, %v3886_v47  ;;  %v1625_v31 = vmul.f32 1.442695, %v1622_v36  ;;  %v3952_v36 = vpop.f32.mrf.mxu1 }
 0x1c4   : > { %v2899_v49 = vpop.eup %2898  ;;  %v1571_v38 = vmul.f32 %v2897_v32, %v3853_v0  ;;  %v1631_v6 = vmul.f32 1.442695, %v1628_v44  ;;  %2918 = vpow2.f32 %v1657_v59  ;;  %v1663_v17 = vmul.f32 1.442695, %v1660_v50 }
 0x1c5   : > { %v2901_v12 = vpop.eup %2900  ;;  %v3931_v42 = vmul.f32 %v2899_v49, %v3883_v48  ;;  %v1580_v1 = vadd.f32 %v2897_v32, %v1578_v2  ;;  %2920 = vpow2.f32 %v1625_v31  ;;  %v1682_v45 = vadd.f32 %v3936_v61, %v3920_v33 }
 0x1c6   : > { %v2903_v28 = vpop.eup %2902  ;;  %v1607_v29 = vmul.f32 %v2901_v12, %v3886_v47  ;;  %v3941_v53 = vadd.f32 %v1571_v38, %v1569_v34  ;;  %v1601_v5 = vmul.f32 %v2901_v12, %v1540_v51  ;;  %2922 = vpow2.f32 %v1631_v6 }
 0x1c7   : > { %v2905_v46 = vpop.eup %2904  ;;  %v1603_v48 = vmul.f32 %v2903_v28, %v3853_v0  ;;  %2924 = vrcp.f32 %v1580_v1  ;;  %v1684_v54 = vmax.f32 %v3873_v20, %v1682_v45  ;;  %v1714_v21 = vadd.f32 %v3873_v20, %v3535_v4 }
 0x1c8   : > { %v2907_v40 = vpop.eup %2906  ;;  %v1609_v60 = vadd.f32 %v2903_v28, %v1607_v29  ;;  %v1633_v3 = vmul.f32 %v2905_v46, %v1604_v37  ;;  %v1642_v11 = vmul.f32 %v2905_v46, %v1608_v22  ;;  %2926 = vpow2.f32 %v1663_v17 }
 0x1c9   : > { %v2909_v9 = vpop.eup %2908  ;;  %v1605_v47 = vadd.f32 %v1603_v48, %v1601_v5  ;;  %v1635_v35 = vmul.f32 %v2907_v40, %v3910_v13  ;;  %2928 = vpow2.f32 %v2412_v30  ;;  %v1686_v51 = vsub.f32 %v3873_v20, %v1684_v54 }
 0x1ca   : > { %v2911_v15 = vpop.eup %2910  ;;  %v3950_v0 = vmul.f32 %v2909_v9, %v3903_v63  ;;  %v1644_v25 = vadd.f32 %v2907_v40, %v1642_v11  ;;  %2930 = vpow2.f32 %v2410_v43  ;;  %v1692_v58 = vsub.f32 %v1682_v45, %v1684_v54 }
 0x1cb   : > { %v2913_v44 = vpop.eup %2912  ;;  %v1879_v50 = vadd.f32 1.0, %v2911_v15  ;;  %v3954_v24 = vadd.f32 %v1635_v35, %v1633_v3  ;;  %v1688_v59 = vmul.f32 1.442695, %v1686_v51  ;;  %v3957_v32 = vmax.f32 %v1714_v21, %v3920_v33 }
 0x1cc   : > { %v2915_v30 = vpop.eup %2914  ;;  %v1671_v34 = vmul.f32 %v2913_v44, %v1608_v22  ;;  %v1665_v20 = vmul.f32 %v2913_v44, %v1604_v37  ;;  %2932 = vrcp.f32 %v1644_v25  ;;  %v1694_v2 = vmul.f32 1.442695, %v1692_v58  ;;  %v1034_v22 = vpop.f32.mrf.mxu1 }
 0x1cd   : > { %v2917_v63 = vpop.eup %2916  ;;  %2934 = vrcp.f32 %v1879_v50  ;;  %v1667_v43 = vmul.f32 %v2915_v30, %v3910_v13  ;;  %v1718_v31 = vsub.f32 %v1714_v21, %v3957_v32  ;;  %v1724_v49 = vsub.f32 %v3920_v33, %v3957_v32 }
 0x1ce   : > { %v3963_v38 = vadd.f32 %v2915_v30, %v1671_v34  ;;  %v1877_v6 = vadd.f32 1.0, %v2917_v63  ;;  %2936 = vpow2.f32 %v1688_v59  ;;  %v1194_v17 = vadd.f32 %v3793_v19, %v3584_v62 }
 0x1cf   : > { %v3967_v37 = vadd.f32 %v1667_v43, %v1665_v20  ;;  %2938 = vpow2.f32 %v1694_v2  ;;  %v1720_v12 = vmul.f32 1.442695, %v1718_v31  ;;  %v1726_v1 = vmul.f32 1.442695, %v1724_v49 }
 0x1d0   : > { %2940 = vrcp.f32 %v1877_v6  ;;  %v2415_v13 = vmul.f32 -1.442695, %v1194_v17  ;;  %v1188_v45 = vadd.f32 %v3562_v39, %v3800_v8  ;;  %v1202_v33 = vadd.f32 %v3890_v18, %v3677_v56  ;;  %v3977_v8 = vpop.f32.mrf.mxu1  ;;  %v4222_v17 = vld [vmem:[#allocation34_spill] sm:$0xff] }
 0x1d1   : > { %v2919_v28 = vpop.eup %2918  ;;  %2942 = vpow2.f32 %v1720_v12  ;;  %v1207_v29 = vadd.f32 %v1034_v22, %v3714_v23  ;;  %v1715_v62 = vadd.f32 %v3912_v10, %v3535_v4  ;;  %v1191_v31 = vadd.f32 %v3572_v52, %v3813_v41 }
 0x1d2   : > { %v2921_v19 = vpop.eup %2920  ;;  %v1672_v5 = vmul.f32 %v2919_v28, %v1609_v60  ;;  %v1666_v46 = vmul.f32 %v2919_v28, %v1605_v47  ;;  %2944 = vpow2.f32 %v1726_v1  ;;  %v2413_v48 = vmul.f32 -1.442695, %v1188_v45  ;;  %v1040_v30 = vpop.f32.mrf.mxu1  ;;  %v4223_v1 = vld [vmem:[#allocation32_spill] sm:$0xff] }
 0x1d3   : > { %v2923_v54 = vpop.eup %2922  ;;  %v1634_v21 = vmul.f32 %v2921_v19, %v1605_v47  ;;  %v1643_v40 = vmul.f32 %v2921_v19, %v1609_v60  ;;  %2946 = vpow2.f32 %v2415_v13  ;;  %v1683_v39 = vadd.f32 %v3936_v61, %v1207_v29 }
 0x1d4   : > { %v2925_v56 = vpop.eup %2924  ;;  %v1636_v18 = vmul.f32 %v2923_v54, %v1202_v33  ;;  %2948 = vpow2.f32 %v2413_v48  ;;  %v3979_v23 = vmax.f32 %v1715_v62, %v1207_v29  ;;  %v1197_v60 = vadd.f32 %v3810_v55, %v3593_v7 }
 0x1d5   : > { %v2927_v3 = vpop.eup %2926  ;;  %v3982_v11 = vmul.f32 %v2925_v56, %v3941_v53  ;;  %v1645_v9 = vadd.f32 %v2923_v54, %v1643_v40  ;;  %v1685_v35 = vmax.f32 %v3912_v10, %v1683_v39  ;;  %v1210_v22 = vadd.f32 %v1040_v30, %v4222_v17 }
 0x1d6   : > { %v2929_v47 = vpop.eup %2928  ;;  %v3987_v51 = vadd.f32 %v2927_v3, %v1672_v5  ;;  %v3989_v15 = vadd.f32 %v1636_v18, %v1634_v21  ;;  %v1668_v25 = vmul.f32 %v2927_v3, %v1202_v33  ;;  %v1719_v58 = vsub.f32 %v1715_v62, %v3979_v23  ;;  %v4224_v21 = vld [vmem:[#allocation29_spill] sm:$0xff] }
 0x1d7   : > { %v2931_v44 = vpop.eup %2930  ;;  %v1880_v50 = vadd.f32 1.0, %v2929_v47  ;;  %2950 = vrcp.f32 %v1645_v9  ;;  %v1687_v53 = vsub.f32 %v3912_v10, %v1685_v35  ;;  %v1693_v59 = vsub.f32 %v1683_v39, %v1685_v35 }
 0x1d8   : > { %v3993_v34 = vadd.f32 %v1668_v25, %v1666_v46  ;;  %v1878_v20 = vadd.f32 1.0, %v2931_v44  ;;  %v1722_v2 = vmul.f32 1.442695, %v1719_v58  ;;  %v1725_v7 = vsub.f32 %v1207_v29, %v3979_v23 }
 0x1d9   : > { %v2933_v55 = vpop.eup %2932  ;;  %2952 = vrcp.f32 %v1880_v50  ;;  %v1690_v63 = vmul.f32 1.442695, %v1687_v53  ;;  %v1696_v43 = vmul.f32 1.442695, %v1693_v59  ;;  %v1205_v13 = vadd.f32 %v3952_v36, %v4223_v1  ;;  %v4013_v36 = vpop.f32.mrf.mxu1 }
 0x1da   : > { %v3998_v49 = vpop.eup %2934  ;;  %v4001_v6 = vmul.f32 %v2933_v55, %v3954_v24  ;;  %2954 = vrcp.f32 %v1878_v20  ;;  %v1728_v10 = vmul.f32 1.442695, %v1725_v7  ;;  %v2416_v45 = vmul.f32 -1.442695, %v1197_v60  ;;  %v4226_v55 = vld [vmem:[#allocation36_spill] sm:$0xff] }
 0x1db   : > { %v2937_v12 = vpop.eup %2936  ;;  %2956 = vpow2.f32 %v1690_v63  ;;  %v1779_v28 = vadd.f32 %v3957_v32, %v3535_v4  ;;  %v1747_v24 = vadd.f32 %v3936_v61, %v1210_v22  ;;  %v2414_v19 = vmul.f32 -1.442695, %v1191_v31  ;;  %v1044_v50 = vpop.f32.mrf.mxu1  ;;  %v4227_v31 = vld [vmem:[#allocation31_spill] sm:$0xff] }
 0x1dc   : > { %v2939_v33 = vpop.eup %2938  ;;  %v1698_v52 = vmul.f32 %v2937_v12, %v3967_v37  ;;  %v1707_v41 = vmul.f32 %v2937_v12, %v3963_v38  ;;  %2958 = vpow2.f32 %v1696_v43  ;;  %v1206_v40 = vadd.f32 %v3825_v27, %v4224_v21 }
 0x1dd   : > { %v4011_v29 = vpop.eup %2940  ;;  %v1700_v62 = vmul.f32 %v2939_v33, %v1205_v13  ;;  %2960 = vpow2.f32 %v1722_v2  ;;  %v1781_v5 = vmax.f32 %v1779_v28, %v1210_v22  ;;  %v1749_v54 = vmax.f32 %v3957_v32, %v1747_v24  ;;  %v4225_v2 = vld [vmem:[#allocation26_spill] sm:$0xff] }
 0x1de   : > { %v2943_v46 = vpop.eup %2942  ;;  %v1709_v48 = vadd.f32 %v2939_v33, %v1707_v41  ;;  %2962 = vpow2.f32 %v1728_v10  ;;  %v1200_v7 = vadd.f32 %v4225_v2, %v3841_v57  ;;  %v1213_v63 = vadd.f32 %v1044_v50, %v4226_v55  ;;  %v4228_v10 = vld [vmem:[#allocation41_spill] sm:$0xff]  ;;  %v4233_v55 = vld [vmem:[#allocation30_spill] sm:$0xff] }
 0x1df   : > { %v2945_v39 = vpop.eup %2944  ;;  %v1736_v56 = vmul.f32 %v2943_v46, %v3963_v38  ;;  %v4019_v18 = vadd.f32 %v1700_v62, %v1698_v52  ;;  %v1730_v3 = vmul.f32 %v2943_v46, %v3967_v37  ;;  %2964 = vpow2.f32 %v2416_v45  ;;  %1809 = vst [vmem:[#allocation7 + $0x8] sm:$0xff] %v1781_v5  ;;  %v4229_v52 = vld [vmem:[#allocation33_spill] sm:$0xff] }
 0x1e0   : > { %v2947_v9 = vpop.eup %2946  ;;  %v1732_v35 = vmul.f32 %v2945_v39, %v1205_v13  ;;  %2966 = vrcp.f32 %v1709_v48  ;;  %v1751_v60 = vsub.f32 %v3957_v32, %v1749_v54  ;;  %v1757_v47 = vsub.f32 %v1747_v24, %v1749_v54 }
 0x1e1   : > { %v2949_v25 = vpop.eup %2948  ;;  %v4023_v58 = vadd.f32 %v2945_v39, %v1736_v56  ;;  %v1883_v44 = vadd.f32 1.0, %v2947_v9  ;;  %2968 = vpow2.f32 %v2414_v19  ;;  %v1783_v27 = vsub.f32 %v1779_v28, %v1781_v5  ;;  %v4230_v19 = vld [vmem:[#allocation42_spill] sm:$0xff] }
 0x1e2   : > { %v4025_v38 = vadd.f32 %v1732_v35, %v1730_v3  ;;  %v1881_v53 = vadd.f32 1.0, %v2949_v25  ;;  %v1753_v59 = vmul.f32 1.442695, %v1751_v60  ;;  %v1759_v37 = vmul.f32 1.442695, %v1757_v47  ;;  %v4232_v47 = vld [vmem:[#allocation28_spill] sm:$0xff] }
 0x1e3   : > { %2970 = vrcp.f32 %v1883_v44  ;;  %v1785_v30 = vmul.f32 1.442695, %v1783_v27  ;;  %v1789_v20 = vsub.f32 %v1210_v22, %v1781_v5  ;;  %v1780_v43 = vadd.f32 %v3979_v23, %v3535_v4  ;;  %v4231_v5 = vld [vmem:[#allocation27_spill] sm:$0xff] }
 0x1e4   : > { %v2951_v32 = vpop.eup %2950  ;;  %2972 = vrcp.f32 %v1881_v53  ;;  %v1209_v17 = vadd.f32 %v4228_v10, %v4227_v31  ;;  %v2419_v13 = vmul.f32 -1.442695, %v1206_v40  ;;  %v2417_v45 = vmul.f32 -1.442695, %v1200_v7 }
 0x1e5   : > { %v4035_v12 = vmul.f32 %v2951_v32, %v3989_v15  ;;  %2974 = vpow2.f32 %v1753_v59  ;;  %v1791_v1 = vmul.f32 1.442695, %v1789_v20  ;;  %v1748_v57 = vadd.f32 %v3936_v61, %v1213_v63 }
 0x1e6   : > { %v2953_v22 = vpop.eup %2952  ;;  %2976 = vpow2.f32 %v1759_v37  ;;  %v1782_v28 = vmax.f32 %v1780_v43, %v1213_v63  ;;  %v1208_v41 = vadd.f32 %v3977_v8, %v4229_v52  ;;  %v2420_v4 = vmul.f32 -1.442695, %v1209_v17  ;;  %v1144_v37 = vpop.f32.mrf.mxu0  ;;  %v4235_v17 = vld [vmem:[#allocation39_spill] sm:$0xff] }
 0x1e7   : > { %v2955_v33 = vpop.eup %2954  ;;  %2978 = vpow2.f32 %v1785_v30  ;;  %v1750_v15 = vmax.f32 %v3979_v23, %v1748_v57  ;;  %v1203_v46 = vadd.f32 %v4231_v5, %v4230_v19  ;;  %v1212_v25 = vadd.f32 %v4232_v47, %v3880_v26  ;;  %v4238_v47 = vld [vmem:[#allocation37_spill] sm:$0xff] }
 0x1e8   : > { %v2957_v24 = vpop.eup %2956  ;;  %2980 = vpow2.f32 %v1791_v1  ;;  %v1784_v62 = vsub.f32 %v1780_v43, %v1782_v28  ;;  %1810 = vst [vmem:[#allocation7] sm:$0xff] %v1782_v28  ;;  %v1790_v21 = vsub.f32 %v1213_v63, %v1782_v28  ;;  %v1215_v63 = vadd.f32 %v4233_v55, %v1144_v37  ;;  %v4234_v43 = vld [vmem:[#allocation38_spill] sm:$0xff]  ;;  %v4237_v28 = vld [vmem:[#allocation35_spill] sm:$0xff] }
 0x1e9   : > { %v2959_v48 = vpop.eup %2958  ;;  %v1699_v54 = vmul.f32 %v2957_v24, %v3993_v34  ;;  %v1708_v61 = vmul.f32 %v2957_v24, %v3987_v51  ;;  %2982 = vpow2.f32 %v2419_v13  ;;  %v1752_v39 = vsub.f32 %v3979_v23, %v1750_v15  ;;  %v4236_v13 = vld [vmem:[#allocation40_spill] sm:$0xff] }
 0x1ea   : > { %v2961_v40 = vpop.eup %2960  ;;  %v1701_v8 = vmul.f32 %v2959_v48, %v1208_v41  ;;  %2984 = vpow2.f32 %v2417_v45  ;;  %v1758_v56 = vsub.f32 %v1748_v57, %v1750_v15  ;;  %v1787_v2 = vmul.f32 1.442695, %v1784_v62 }
 0x1eb   : > { %v2963_v3 = vpop.eup %2962  ;;  %v1737_v9 = vmul.f32 %v2961_v40, %v3987_v51  ;;  %v1710_v35 = vadd.f32 %v2959_v48, %v1708_v61  ;;  %v1731_v60 = vmul.f32 %v2961_v40, %v3993_v34  ;;  %v1755_v53 = vmul.f32 1.442695, %v1752_v39 }
 0x1ec   : > { %v2965_v44 = vpop.eup %2964  ;;  %v4050_v27 = vadd.f32 %v1701_v8, %v1699_v54  ;;  %v1733_v50 = vmul.f32 %v2963_v3, %v1208_v41  ;;  %v1761_v59 = vmul.f32 1.442695, %v1758_v56  ;;  %v1793_v26 = vmul.f32 1.442695, %v1790_v21 }
 0x1ed   : > { %v2967_v30 = vpop.eup %2966  ;;  %v4052_v20 = vadd.f32 %v2963_v3, %v1737_v9  ;;  %v1884_v23 = vadd.f32 1.0, %v2965_v44  ;;  %2986 = vrcp.f32 %v1710_v35  ;;  %v1989_v31 = vmul.f32 %v4011_v29, %v4234_v43  ;;  %v1046_v9 = vpop.f32.mrf.mxu1 }
 0x1ee   : > { %v2969_v51 = vpop.eup %2968  ;;  %v4055_v7 = vmul.f32 %v2967_v30, %v4019_v18  ;;  %v4057_v34 = vadd.f32 %v1733_v50, %v1731_v60  ;;  %2988 = vpow2.f32 %v1755_v53  ;;  %v1990_v1 = vmul.f32 %v2955_v33, %v4235_v17 }
 0x1ef   : > { %2990 = vrcp.f32 %v1884_v23  ;;  %v1882_v32 = vadd.f32 1.0, %v2969_v51  ;;  %v1991_v45 = vmul.f32 %v3998_v49, %v4236_v13  ;;  %v1992_v18 = vmul.f32 %v2953_v22, %v3878_v16 }
 0x1f0   : > { %v2971_v10 = vpop.eup %2970  ;;  %2992 = vpow2.f32 %v1761_v59  ;;  %v1211_v52 = vadd.f32 %v4013_v36, %v4237_v28  ;;  %v2418_v41 = vmul.f32 -1.442695, %v1203_v46  ;;  %v2421_v15 = vmul.f32 -1.442695, %v1212_v25 }
 0x1f1   : > { %v2973_v57 = vpop.eup %2972  ;;  %2994 = vrcp.f32 %v1882_v32  ;;  %v2004_v62 = vpack.c.bf16 %v1990_v1, %v1989_v31  ;;  %v2005_v29 = vpack.c.bf16 %v1992_v18, %v1991_v45  ;;  %v2422_v16 = vmul.f32 -1.442695, %v1215_v63 }
 0x1f2   : > { %v2975_v24 = vpop.eup %2974  ;;  %2996 = vpow2.f32 %v1787_v2  ;;  %v1214_v25 = vadd.f32 %v1046_v9, %v4238_v47  ;;  %v1995_v59 = vmul.f32 %v2971_v10, %v3950_v0  ;;  %v1993_v32 = vmul.f32 %v2973_v57, %v3893_v14 }
 0x1f3   : > { %v2977_v19 = vpop.eup %2976  ;;  %v1763_v5 = vmul.f32 %v2975_v24, %v4025_v38  ;;  %v1772_v33 = vmul.f32 %v2975_v24, %v4023_v58  ;;  %2998 = vpow2.f32 %v1793_v26  ;;  %2569 = vmatmul.mubr.bf16.vlgmr.msra.gmra.mxu0 %v2004_v62 }
 0x1f4   : > { %v2979_v49 = vpop.eup %2978  ;;  %v1765_v48 = vmul.f32 %v2977_v19, %v1211_v52  ;;  %3000 = vpow2.f32 %v2420_v4  ;;  %2572 = vmatprep.mubr.bf16.mxu0 %v2005_v29 }
 0x1f5   : > { %v2981_v22 = vpop.eup %2980  ;;  %v1801_v36 = vmul.f32 %v2979_v49, %v4023_v58  ;;  %v1774_v46 = vadd.f32 %v2977_v19, %v1772_v33  ;;  %v1795_v54 = vmul.f32 %v2979_v49, %v4025_v38  ;;  %3002 = vpow2.f32 %v2418_v41 }
 0x1f6   : > { %v2983_v61 = vpop.eup %2982  ;;  %v1767_v21 = vadd.f32 %v1765_v48, %v1763_v5  ;;  %v1797_v40 = vmul.f32 %v2981_v22, %v1211_v52  ;;  %3004 = vpow2.f32 %v2421_v15 }
 0x1f7   : > { %v2985_v8 = vpop.eup %2984  ;;  %v1803_v39 = vadd.f32 %v2981_v22, %v1801_v36  ;;  %v1887_v56 = vadd.f32 1.0, %v2983_v61  ;;  %3006 = vrcp.f32 %v1774_v46 }
 0x1f8   : > { %v1799_v3 = vadd.f32 %v1797_v40, %v1795_v54  ;;  %v1885_v4 = vadd.f32 1.0, %v2985_v8  ;;  %3008 = vpow2.f32 %v2422_v16 }
 0x1f9   : > { %1807 = vst [vmem:[#allocation6 + $0x8] sm:$0xff] %v1803_v39  ;;  %3010 = vrcp.f32 %v1887_v56 }
 0x1fa   : > { %v2987_v58 = vpop.eup %2986  ;;  %1805 = vst [vmem:[#allocation5] sm:$0xff] %v1799_v3  ;;  %3012 = vrcp.f32 %v1885_v4 }
 0x1fb   : > { %v2989_v38 = vpop.eup %2988  ;;  %v1984_v35 = vmul.f32 %v2987_v58, %v4050_v27 }
 0x1fc   : > { %v2991_v60 = vpop.eup %2990  ;;  %v1764_v44 = vmul.f32 %v2989_v38, %v4057_v34  ;;  %v1773_v50 = vmul.f32 %v2989_v38, %v4052_v20 }
 0x1fd   : > { %v2993_v53 = vpop.eup %2992  ;;  %v1996_v37 = vmul.f32 %v2991_v60, %v3982_v11 }
 0x1fe   : > { %v2995_v30 = vpop.eup %2994  ;;  %v1766_v23 = vmul.f32 %v2993_v53, %v1214_v25  ;;  %v1775_v2 = vadd.f32 %v2993_v53, %v1773_v50 }
 0x1ff   : > { %v2997_v51 = vpop.eup %2996  ;;  %v2007_v26 = vpack.c.bf16 %v1996_v37, %v1995_v59  ;;  %v1994_v27 = vmul.f32 %v2995_v30, %v3931_v42 }
 0x200   : > { %v2999_v55 = vpop.eup %2998  ;;  %v1802_v63 = vmul.f32 %v2997_v51, %v4052_v20  ;;  %v1768_v43 = vadd.f32 %v1766_v23, %v1764_v44  ;;  %v1796_v31 = vmul.f32 %v2997_v51, %v4057_v34  ;;  %3014 = vrcp.f32 %v1775_v2 }
 0x201   : > { %v3001_v17 = vpop.eup %3000  ;;  %v1798_v0 = vmul.f32 %v2999_v55, %v1214_v25  ;;  %2576 = vmatprep.mubr.bf16.mxu1 %v2007_v26  ;;  %v2006_v11 = vpack.c.bf16 %v1994_v27, %v1993_v32 }
 0x202   : > { %v3003_v10 = vpop.eup %3002  ;;  %v1804_v1 = vadd.f32 %v2999_v55, %v1802_v63  ;;  %v1888_v13 = vadd.f32 1.0, %v3001_v17 }
 0x203   : > { %v3005_v45 = vpop.eup %3004  ;;  %v1800_v18 = vadd.f32 %v1798_v0, %v1796_v31  ;;  %v1886_v28 = vadd.f32 1.0, %v3003_v10  ;;  %2573 = vmatmul.mubr.bf16.gmra.mxu0 %v2006_v11 }
 0x204   : > { %v3007_v14 = vpop.eup %3006  ;;  %1808 = vst [vmem:[#allocation6] sm:$0xff] %v1804_v1  ;;  %3016 = vrcp.f32 %v1888_v13  ;;  %v1889_v42 = vadd.f32 1.0, %v3005_v45 }
 0x205   : > { %v3009_v20 = vpop.eup %3008  ;;  %v1985_v57 = vmul.f32 %v3007_v14, %v1767_v21  ;;  %1806 = vst [vmem:[#allocation5 + $0x8] sm:$0xff] %v1800_v18  ;;  %3018 = vrcp.f32 %v1886_v28 }
 0x206   : > { %v3011_v34 = vpop.eup %3010  ;;  %3020 = vrcp.f32 %v1889_v42  ;;  %v1890_v52 = vadd.f32 1.0, %v3009_v20 }
 0x207   : > { %v3013_v41 = vpop.eup %3012  ;;  %v1999_v24 = vmul.f32 %v3011_v34, %v4055_v7 }
 0x208   : > { %3022 = vrcp.f32 %v1890_v52  ;;  %v1997_v15 = vmul.f32 %v3013_v41, %v4001_v6  ;;  %v1050_v6 = vpop.f32.mrf.mxu1 }
 0x209   : > { %1258 = vst [vmem:[#allocation8] sm:$0xff] %v1050_v6 }
 0x20a   : > { %v1052_v61 = vpop.f32.mrf.mxu1 }
 0x20b   : > { %1259 = vst [vmem:[#allocation8 + $0x8] sm:$0xff] %v1052_v61 }
 0x20d   : > { %v3015_v62 = vpop.eup %3014 }
 0x20e   : > { %v1986_v29 = vmul.f32 %v3015_v62, %v1768_v43 }
 0x211   : > { %v3017_v19 = vpop.eup %3016 }
 0x212   : > { %v3019_v5 = vpop.eup %3018  ;;  %v2000_v33 = vmul.f32 %v3017_v19, %v1984_v35 }
 0x213   : > { %v3021_v49 = vpop.eup %3020  ;;  %v1998_v48 = vmul.f32 %v3019_v5, %v4035_v12  ;;  %v1054_v12 = vpop.f32.mrf.mxu1 }
 0x214   : > { %v2009_v16 = vpack.c.bf16 %v2000_v33, %v1999_v24  ;;  %v2001_v22 = vmul.f32 %v3021_v49, %v1985_v57  ;;  %1261 = vst [vmem:[#allocation8 + $0x28] sm:$0xff] %v1054_v12 }
 0x215   : > { %v3023_v36 = vpop.eup %3022  ;;  %v2008_v46 = vpack.c.bf16 %v1998_v48, %v1997_v15  ;;  %v1056_v21 = vpop.f32.mrf.mxu1 }
 0x216   : > { %v2002_v54 = vmul.f32 %v3023_v36, %v1986_v29  ;;  %1262 = vst [vmem:[#allocation8 + $0x20] sm:$0xff] %v1056_v21 }
 0x217   : > { %2577 = vmatmul.mubr.bf16.vlgmr.msra.gmra.mxu1 %v2008_v46 }
 0x218   : > { %2580 = vmatprep.mubr.bf16.mxu1 %v2009_v16  ;;  %v2010_v7 = vpack.c.bf16 %v2002_v54, %v2001_v22 }
 0x21f   : > { %2581 = vmatmul.mubr.bf16.gmra.mxu1 %v2010_v7 }
 0x2b3   : > { %v2570_v40 = vpop.f32.mrf.mxu0 }
 0x2b4   : > { %2174 = vst [vmem:[%s3463_s21 + $0x10] sm:$0xff] %v2570_v40 }
 0x2b5   : > { %v2109_v8 = vpop.f32.mrf.mxu0 }
 0x2b6   : > { %2172 = vst [vmem:[%s3463_s21] sm:$0xff] %v2109_v8 }
 0x2b7   : > { %v2571_v39 = vpop.f32.mrf.mxu0 }
 0x2b8   : > { %2175 = vst [vmem:[%s3463_s21 + $0x18] sm:$0xff] %v2571_v39 }
 0x2b9   : > { %v2112_v56 = vpop.f32.mrf.mxu0 }
 0x2ba   : > { %2173 = vst [vmem:[%s3463_s21 + $0x8] sm:$0xff] %v2112_v56 }
 0x2c3   : > { %v2574_v3 = vpop.f32.mrf.mxu0 }
 0x2c4   : > { %2178 = vst [vmem:[%s3463_s21 + $0x30] sm:$0xff] %v2574_v3 }
 0x2c5   : > { %v2125_v4 = vpop.f32.mrf.mxu0 }
 0x2c6   : > { %2176 = vst [vmem:[%s3463_s21 + $0x20] sm:$0xff] %v2125_v4 }
 0x2c7   : > { %v2575_v9 = vpop.f32.mrf.mxu0 }
 0x2c8   : > { %2179 = vst [vmem:[%s3463_s21 + $0x38] sm:$0xff] %v2575_v9 }
 0x2c9   : > { %v2128_v58 = vpop.f32.mrf.mxu0 }
 0x2ca   : > { %2177 = vst [vmem:[%s3463_s21 + $0x28] sm:$0xff] %v2128_v58 }
 0x2d7   : > { %v2578_v38 = vpop.f32.mrf.mxu1 }
 0x2d8   : > { %2182 = vst [vmem:[%s3463_s21 + $0x50] sm:$0xff] %v2578_v38 }
 0x2d9   : > { %v2141_v35 = vpop.f32.mrf.mxu1 }
 0x2da   : > { %2180 = vst [vmem:[%s3463_s21 + $0x40] sm:$0xff] %v2141_v35 }
 0x2db   : > { %v2579_v60 = vpop.f32.mrf.mxu1 }
 0x2dc   : > { %2183 = vst [vmem:[%s3463_s21 + $0x58] sm:$0xff] %v2579_v60 }
 0x2dd   : > { %v2144_v47 = vpop.f32.mrf.mxu1 }
 0x2de   : > { %2181 = vst [vmem:[%s3463_s21 + $0x48] sm:$0xff] %v2144_v47 }
 0x2df   : > { %v2582_v25 = vpop.f32.mrf.mxu1 }
 0x2e0   : > { %2186 = vst [vmem:[%s3463_s21 + $0x70] sm:$0xff] %v2582_v25 }
 0x2e1   : > { %v2157_v44 = vpop.f32.mrf.mxu1 }
 0x2e2   : > { %2184 = vst [vmem:[%s3463_s21 + $0x60] sm:$0xff] %v2157_v44 }
 0x2e3   : > { %v2583_v50 = vpop.f32.mrf.mxu1 }
 0x2e4   : > { %2187 = vst [vmem:[%s3463_s21 + $0x78] sm:$0xff] %v2583_v50 }
 0x2e5   : > { %v2160_v53 = vpop.f32.mrf.mxu1 }
 0x2e6   : > { %2185 = vst [vmem:[%s3463_s21 + $0x68] sm:$0xff] %v2160_v53 }
 0x2e7   : > { %3144 = shalt.err (!%p3141_p4)
}
 0x2e8   : > { %s3145_s21 = scalar_lea.hbm %s4105_s13, 2048  ;;  %s3149_s8 = scalar_lea.hbm %s4240_s18, 8192 }
 0x2e9   : > { %p3146_p8 = scmp.ne.s32.totalorder %s4105_s13, %s3145_s21  ;;  %p3150_p10 = scmp.lt.s32.totalorder %s4105_s13, %s4240_s18 }
 0x2ea   : > { %p3151_p0 = scmp.lt.s32.totalorder %s3149_s8, %s3145_s21 }
 0x2eb   : > { %p3147_p11 = pnand %p3146_p8, %p3404_p3 }
 0x2ec   : > { %p3152_p5 = por %p3151_p0, %p3150_p10 }
 0x2ed   : > { %p3148_p13 = pneg %p3147_p11 }
 0x2ef   : > { %p3153_p2 = pnand %p3152_p5, %p3148_p13 }
 0x2f1   : > { %3156 = shalt.err (!%p3153_p2)
}
 0x2f2   : > { %s3249_s1 = smov 128   ;;  %s3250_s16 = smov 8  }
 0x2f3   : > { %2614 = dma.vmem_to_hbm [thread:$0]  (%p3404_p3), %s4107_s17, 2048, %s4105_s13, %s2189_s25, %s3249_s1, %s3249_s1, %s3250_s16  }
 0x2f4 PF: > { %s4241_s12 = sld [smem:[#allocation22_spill]]  ;;  %p2641_p7 = scmp.ge.s32.totalorder %s3235_s28, 2 }
 0x2f5   : > { %s4242_s6 = sld [smem:[#allocation24_spill]] }
 0x2fa   : > { %s2220_s26 = sand.u32 1, %s4241_s12  }
 0x2fb   : > { %p4243_p6 = scmp.ne.s32.totalorder %s4242_s6, 0  ;;  %s2221_s24 = scalar_lea.sflag [#allocation11], %s2220_s26 }
 0x2fd   : > { %p2631_p9 = pnand %p2641_p7, %p4243_p6 }
 0x2ff   : > { %p2632_p12 = pneg %p2631_p9 }
 0x301   : > { %3202 = dma.done.wait (%p2632_p12), %s2221_s24, 2048  }
 0x302   : > { %3204 = vsyncadd (%p2632_p12), %s2221_s24, 4294965248  ;;  %s24_s28 = sadd.s32 1, %s3235_s28   ;;  %s4244_s24 = sld [smem:[#allocation23_spill]] }
 0x303   : > { %p21_p1 = scmp.ge.s32.totalorder %s24_s28, 6   ;;  %s4245_s26 = sld [smem:[#allocation25_spill]] }
 0x304   : > { %s4246_s21 = smov %s3211_s22  ;;  %s4247_s22 = smov %s3215_s23 }
 0x305   : > { %s4248_s23 = smov %s3421_s3  ;;  %s4249_s25 = smov %s3231_s27 }
 0x306   : > { %s4250_s27 = smov %s4256_s15  ;;  %23 = sbr.rel (!%p21_p1) target bundleno = 14 (0xe), region = 127 }
 0x30b   :  { %2226 = vsyncpa [#allocation10], 1 }
 0x30c   :  { %2228 = vsyncpa [#allocation10 + $0x1], 1 }
 0x30d   :  { %2229 = vsyncpa [#allocation13], 1 }
 0x30e   :  { %2230 = vsyncpa [#allocation16], 1 }
 0x30f   :  { %2231 = vsyncpa [#allocation11], 1 }
 0x310   :  { %2233 = vsyncpa [#allocation11 + $0x1], 1 }

</bundles_post_ra>
